<compile_context>
chip_gen: v6e
topology: v6e:2x2x1
jax: 0.10.0
libtpu: 0.0.40
codegen_flags: <defaults>
</compile_context>

<pallas_src>
import functools

import jax
import jax.numpy as jnp
from jax.experimental import pallas as pl
from jax.experimental.pallas import tpu as pltpu

NUM_CLASSES = 10   # kthvalue(10) in the reference implies exactly 10 classes
_LANE = 128
_NEG = -1e30       # Python float -> inlined literal, never a captured constant


def _hard_bootstrap_kernel(epoch_num, logits_ref, labels_ref, outf_ref, outi_ref):
    C = logits_ref.shape[0]
    f32 = jnp.float32
    i32 = jnp.int32

    # Per-class rows, samples on the lane axis; each row is (1, TILE_N).
    x = [logits_ref[pl.ds(c, 1), :].astype(f32) for c in range(C)]
    y_row = labels_ref[pl.ds(0, 1), :]       # (1, T) int32  (y)
    ycs_row = labels_ref[pl.ds(1, 1), :]     # (1, T) int32  (y_cs)

    # ---- softmax / log-softmax (detached in the reference), unrolled VPU ----
    row_max = x[0]
    for c in range(1, C):
        row_max = jnp.maximum(row_max, x[c])
    sh = [x[c] - row_max for c in range(C)]
    ex = [jnp.exp(sh[c]) for c in range(C)]
    denom = ex[0]
    for c in range(1, C):
        denom = denom + ex[c]
    inv_denom = 1.0 / denom
    log_denom = jnp.log(denom)
    p = [ex[c] * inv_denom for c in range(C)]         # softmax rows
    logp = [sh[c] - log_denom for c in range(C)]      # log-softmax rows

    # ---- top-7 extraction (kthvalue(11-k) == k-th largest) + argmax index ----
    pm = list(p)
    tops = []
    max1_mun = None
    for it in range(7):
        v = pm[0]
        for c in range(1, C):
            v = jnp.maximum(v, pm[c])
        tops.append(v)
        if it == 0:
            idx = jnp.full(v.shape, C, dtype=i32)
            for c in range(C - 1, -1, -1):            # lowest matching index wins
                idx = jnp.where(p[c] == v, c, idx)
            max1_mun = idx
        if it < 6:
            # Remove only the first (lowest-index) occurrence of v, matching
            # the original index-based masking (preserves tie behavior).
            found = jnp.zeros(v.shape, dtype=i32)
            for c in range(C):
                hit = jnp.logical_and(pm[c] == v, found == 0)
                pm[c] = jnp.where(hit, _NEG, pm[c])
                found = found + hit.astype(i32)
    max_1, max_2, max_3, max_4, max_5, _max_6, max_7 = tops
    max_10 = p[0]                                      # kthvalue(1) == row min
    for c in range(1, C):
        max_10 = jnp.minimum(max_10, p[c])

    # ---- gathers p[i, y[i]] / p[i, y_cs[i]] via per-class scalar compares ----
    fy = jnp.zeros_like(max_1)
    fy_cs = jnp.zeros_like(max_1)
    for c in range(C):
        fy = jnp.where(y_row == c, p[c], fy)
        fy_cs = jnp.where(ycs_row == c, p[c], fy_cs)

    s = (fy < 0.1).astype(i32)                         # (1, T)
    one_m_s = 1 - s
    z1 = s * max1_mun + one_m_s * y_row                # (1, T) int32

    cond_a = jnp.logical_and(max_1 / max_2 > max_2 / max_10,
                             fy < max_3).astype(i32)
    eq_y = (max1_mun == y_row).astype(i32)
    eq_ycs = (max1_mun == ycs_row).astype(i32)
    term = s * cond_a + one_m_s * eq_y                 # per-sample tk2 contribution
    tk_per = eq_ycs * term                             # per-sample tk  contribution
    fy_cs_leq = (fy_cs <= max_7).astype(i32)           # per-sample fy_cs_num contribution

    # ---- F.cross_entropy(y_pred, z1, reduction='none') ----
    ce = jnp.zeros_like(max_1)
    for c in range(C):
        ce = jnp.where(z1 == c, -logp[c], ce)

    if epoch_num > 2000:
        bootstrap = ce * max_1
    else:
        if epoch_num > 50:
            y_p_s = (max_1 < 0.95).astype(i32)
            y_local = 1 - s * y_p_s - (max1_mun != y_row).astype(i32) * one_m_s
        else:
            y_p_s = (max_1 < 1.0).astype(i32)
            y_local = 1 - s * y_p_s
        bootstrap = ce * y_local.astype(f32)

    # ---- packed, lane-dense output slabs ----
    zf = jnp.zeros_like(max_1)
    outf_ref[pl.ds(0, 1), :] = max_1
    outf_ref[pl.ds(1, 1), :] = max_2
    outf_ref[pl.ds(2, 1), :] = max_3
    outf_ref[pl.ds(3, 1), :] = max_4
    outf_ref[pl.ds(4, 1), :] = max_5
    outf_ref[pl.ds(5, 1), :] = bootstrap
    outf_ref[pl.ds(6, 1), :] = zf
    outf_ref[pl.ds(7, 1), :] = zf

    zi = jnp.zeros_like(s)
    outi_ref[pl.ds(0, 1), :] = max1_mun
    outi_ref[pl.ds(1, 1), :] = z1
    outi_ref[pl.ds(2, 1), :] = s
    outi_ref[pl.ds(3, 1), :] = fy_cs_leq
    outi_ref[pl.ds(4, 1), :] = term
    outi_ref[pl.ds(5, 1), :] = tk_per
    outi_ref[pl.ds(6, 1), :] = zi
    outi_ref[pl.ds(7, 1), :] = zi


def hard_bootstrapping_loss(y_pred, y, y_cs, epoch_num=0, beta=0.8,
                            reduce=True, tile_n=2048):
    """JAX/Pallas port of HardBootstrappingLoss1.forward (returned values only)."""
    N, C = y_pred.shape
    assert C == NUM_CLASSES, "module semantics (kthvalue(10)) require C == 10"

    # Tile over samples; samples sit on the lane axis so the tile must be a
    # multiple of 128.  TILE_N kept modest (default 2048) to fit v7x VMEM.
    n_lane = ((max(N, 1) + _LANE - 1) // _LANE) * _LANE
    tile = min(int(tile_n), n_lane)
    n_pad = ((N + tile - 1) // tile) * tile

    logits_t = jnp.transpose(y_pred)                           # (C, N), native dtype
    labels = jnp.stack([y.astype(jnp.int32),
                        y_cs.astype(jnp.int32)], axis=0)       # (2, N)
    if n_pad != N:
        logits_t = jnp.pad(logits_t, ((0, 0), (0, n_pad - N)))
        labels = jnp.pad(labels, ((0, 0), (0, n_pad - N)))

    kernel = functools.partial(_hard_bootstrap_kernel, int(epoch_num))
    outf, outi = pl.pallas_call(
        kernel,
        out_shape=(jax.ShapeDtypeStruct((8, n_pad), jnp.float32),
                   jax.ShapeDtypeStruct((8, n_pad), jnp.int32)),
        grid_spec=pltpu.PrefetchScalarGridSpec(
            num_scalar_prefetch=0,
            grid=(n_pad // tile,),
            in_specs=[pl.BlockSpec((C, tile), lambda i: (0, i)),
                      pl.BlockSpec((2, tile), lambda i: (0, i))],
            out_specs=(pl.BlockSpec((8, tile), lambda i: (0, i)),
                       pl.BlockSpec((8, tile), lambda i: (0, i)))),
        compiler_params=pltpu.CompilerParams(
            dimension_semantics=("parallel",)),
    )(logits_t, labels)

    max_1 = outf[0, :N]
    max_2 = outf[1, :N]
    max_3 = outf[2, :N]
    max_4 = outf[3, :N]
    max_5 = outf[4, :N]
    bootstrap = outf[5, :N]
    max1_mun = outi[0, :N]
    z1 = outi[1, :N]
    s = outi[2, :N]

    # Tiny scalar reductions finished in the wrapper (keeps grid axis parallel).
    fy_cs_num = jnp.sum(outi[3, :N])
    tk2 = jnp.sum(outi[4, :N])
    tk = jnp.sum(outi[5, :N])

    if reduce:
        # Reference returns z1 twice in its tuple; we match that exactly.
        return (jnp.mean(bootstrap), fy_cs_num,
                max_1, max_2, max_3, max_4, max_5,
                max1_mun, tk, tk2, z1, z1, s)
    return bootstrap


if __name__ == "__main__":
    key = jax.random.PRNGKey(0)
    k1, k2, k3 = jax.random.split(key, 3)
    N, C = 200, NUM_CLASSES                       # small, non-multiple-of-128 batch
    y_pred = jax.random.normal(k1, (N, C), dtype=jnp.float32)
    y = jax.random.randint(k2, (N,), 0, C, dtype=jnp.int32)
    y_cs = jax.random.randint(k3, (N,), 0, C, dtype=jnp.int32)

    outs = hard_bootstrapping_loss(y_pred, y, y_cs, epoch_num=0)
    jax.block_until_ready(outs)
    print("KERNEL_OK")
</pallas_src>

<mosaic_0001>
module attributes {stable_mosaic.version = 11 : i64} {
  func.func @_hard_bootstrap_kernel(%arg0: i32, %arg1: memref<10x256xf32, #tpu.memory_space<vmem>>, %arg2: memref<2x256xi32, #tpu.memory_space<vmem>>, %arg3: memref<8x256xf32, #tpu.memory_space<vmem>>, %arg4: memref<8x256xi32, #tpu.memory_space<vmem>>) attributes {dimension_semantics = [#tpu.dimension_semantics<parallel>], iteration_bounds = array<i64: 1>, scalar_prefetch = 0 : i64, scratch_operands = 0 : i64, tpu.core_type = #tpu.core_type<tc>, window_params = [{transform_indices = @transform_0, window_bounds = array<i64: 10, 256>}, {transform_indices = @transform_1, window_bounds = array<i64: 2, 256>}, {transform_indices = @transform_2, window_bounds = array<i64: 8, 256>}, {transform_indices = @transform_3, window_bounds = array<i64: 8, 256>}]} {
    %c0 = arith.constant 0 : index
    %c0_0 = arith.constant 0 : index
    %0 = vector.load %arg1[%c0, %c0_0] : memref<10x256xf32, #tpu.memory_space<vmem>>, vector<1x256xf32>
    %c1 = arith.constant 1 : index
    %c0_1 = arith.constant 0 : index
    %1 = vector.load %arg1[%c1, %c0_1] : memref<10x256xf32, #tpu.memory_space<vmem>>, vector<1x256xf32>
    %c2 = arith.constant 2 : index
    %c0_2 = arith.constant 0 : index
    %2 = vector.load %arg1[%c2, %c0_2] : memref<10x256xf32, #tpu.memory_space<vmem>>, vector<1x256xf32>
    %c3 = arith.constant 3 : index
    %c0_3 = arith.constant 0 : index
    %3 = vector.load %arg1[%c3, %c0_3] : memref<10x256xf32, #tpu.memory_space<vmem>>, vector<1x256xf32>
    %c4 = arith.constant 4 : index
    %c0_4 = arith.constant 0 : index
    %4 = vector.load %arg1[%c4, %c0_4] : memref<10x256xf32, #tpu.memory_space<vmem>>, vector<1x256xf32>
    %c5 = arith.constant 5 : index
    %c0_5 = arith.constant 0 : index
    %5 = vector.load %arg1[%c5, %c0_5] : memref<10x256xf32, #tpu.memory_space<vmem>>, vector<1x256xf32>
    %c6 = arith.constant 6 : index
    %c0_6 = arith.constant 0 : index
    %6 = vector.load %arg1[%c6, %c0_6] : memref<10x256xf32, #tpu.memory_space<vmem>>, vector<1x256xf32>
    %c7 = arith.constant 7 : index
    %c0_7 = arith.constant 0 : index
    %7 = vector.load %arg1[%c7, %c0_7] : memref<10x256xf32, #tpu.memory_space<vmem>>, vector<1x256xf32>
    %c8 = arith.constant 8 : index
    %c0_8 = arith.constant 0 : index
    %8 = vector.load %arg1[%c8, %c0_8] : memref<10x256xf32, #tpu.memory_space<vmem>>, vector<1x256xf32>
    %c9 = arith.constant 9 : index
    %c0_9 = arith.constant 0 : index
    %9 = vector.load %arg1[%c9, %c0_9] : memref<10x256xf32, #tpu.memory_space<vmem>>, vector<1x256xf32>
    %c0_10 = arith.constant 0 : index
    %c0_11 = arith.constant 0 : index
    %10 = vector.load %arg2[%c0_10, %c0_11] : memref<2x256xi32, #tpu.memory_space<vmem>>, vector<1x256xi32>
    %c1_12 = arith.constant 1 : index
    %c0_13 = arith.constant 0 : index
    %11 = vector.load %arg2[%c1_12, %c0_13] : memref<2x256xi32, #tpu.memory_space<vmem>>, vector<1x256xi32>
    %12 = arith.maximumf %0, %1 : vector<1x256xf32>
    %13 = arith.maximumf %12, %2 : vector<1x256xf32>
    %14 = arith.maximumf %13, %3 : vector<1x256xf32>
    %15 = arith.maximumf %14, %4 : vector<1x256xf32>
    %16 = arith.maximumf %15, %5 : vector<1x256xf32>
    %17 = arith.maximumf %16, %6 : vector<1x256xf32>
    %18 = arith.maximumf %17, %7 : vector<1x256xf32>
    %19 = arith.maximumf %18, %8 : vector<1x256xf32>
    %20 = arith.maximumf %19, %9 : vector<1x256xf32>
    %21 = arith.subf %0, %20 : vector<1x256xf32>
    %22 = arith.subf %1, %20 : vector<1x256xf32>
    %23 = arith.subf %2, %20 : vector<1x256xf32>
    %24 = arith.subf %3, %20 : vector<1x256xf32>
    %25 = arith.subf %4, %20 : vector<1x256xf32>
    %26 = arith.subf %5, %20 : vector<1x256xf32>
    %27 = arith.subf %6, %20 : vector<1x256xf32>
    %28 = arith.subf %7, %20 : vector<1x256xf32>
    %29 = arith.subf %8, %20 : vector<1x256xf32>
    %30 = arith.subf %9, %20 : vector<1x256xf32>
    %31 = math.exp %21 : vector<1x256xf32>
    %32 = math.exp %22 : vector<1x256xf32>
    %33 = math.exp %23 : vector<1x256xf32>
    %34 = math.exp %24 : vector<1x256xf32>
    %35 = math.exp %25 : vector<1x256xf32>
    %36 = math.exp %26 : vector<1x256xf32>
    %37 = math.exp %27 : vector<1x256xf32>
    %38 = math.exp %28 : vector<1x256xf32>
    %39 = math.exp %29 : vector<1x256xf32>
    %40 = math.exp %30 : vector<1x256xf32>
    %41 = arith.addf %31, %32 : vector<1x256xf32>
    %42 = arith.addf %41, %33 : vector<1x256xf32>
    %43 = arith.addf %42, %34 : vector<1x256xf32>
    %44 = arith.addf %43, %35 : vector<1x256xf32>
    %45 = arith.addf %44, %36 : vector<1x256xf32>
    %46 = arith.addf %45, %37 : vector<1x256xf32>
    %47 = arith.addf %46, %38 : vector<1x256xf32>
    %48 = arith.addf %47, %39 : vector<1x256xf32>
    %49 = arith.addf %48, %40 : vector<1x256xf32>
    %cst = arith.constant 1.000000e+00 : f32
    %50 = vector.broadcast %cst : f32 to vector<1x256xf32>
    %51 = arith.divf %50, %49 : vector<1x256xf32>
    %52 = math.log %49 : vector<1x256xf32>
    %53 = arith.mulf %31, %51 : vector<1x256xf32>
    %54 = arith.mulf %32, %51 : vector<1x256xf32>
    %55 = arith.mulf %33, %51 : vector<1x256xf32>
    %56 = arith.mulf %34, %51 : vector<1x256xf32>
    %57 = arith.mulf %35, %51 : vector<1x256xf32>
    %58 = arith.mulf %36, %51 : vector<1x256xf32>
    %59 = arith.mulf %37, %51 : vector<1x256xf32>
    %60 = arith.mulf %38, %51 : vector<1x256xf32>
    %61 = arith.mulf %39, %51 : vector<1x256xf32>
    %62 = arith.mulf %40, %51 : vector<1x256xf32>
    %63 = arith.subf %21, %52 : vector<1x256xf32>
    %64 = arith.subf %22, %52 : vector<1x256xf32>
    %65 = arith.subf %23, %52 : vector<1x256xf32>
    %66 = arith.subf %24, %52 : vector<1x256xf32>
    %67 = arith.subf %25, %52 : vector<1x256xf32>
    %68 = arith.subf %26, %52 : vector<1x256xf32>
    %69 = arith.subf %27, %52 : vector<1x256xf32>
    %70 = arith.subf %28, %52 : vector<1x256xf32>
    %71 = arith.subf %29, %52 : vector<1x256xf32>
    %72 = arith.subf %30, %52 : vector<1x256xf32>
    %73 = arith.maximumf %53, %54 : vector<1x256xf32>
    %74 = arith.maximumf %73, %55 : vector<1x256xf32>
    %75 = arith.maximumf %74, %56 : vector<1x256xf32>
    %76 = arith.maximumf %75, %57 : vector<1x256xf32>
    %77 = arith.maximumf %76, %58 : vector<1x256xf32>
    %78 = arith.maximumf %77, %59 : vector<1x256xf32>
    %79 = arith.maximumf %78, %60 : vector<1x256xf32>
    %80 = arith.maximumf %79, %61 : vector<1x256xf32>
    %81 = arith.maximumf %80, %62 : vector<1x256xf32>
    %c10_i32 = arith.constant 10 : i32
    %82 = vector.broadcast %c10_i32 : i32 to vector<1x256xi32>
    %83 = arith.cmpf oeq, %62, %81 : vector<1x256xf32>
    %c9_i32 = arith.constant 9 : i32
    %84 = vector.broadcast %c9_i32 : i32 to vector<1x256xi32>
    %85 = arith.select %83, %84, %82 : vector<1x256xi1>, vector<1x256xi32>
    %86 = arith.cmpf oeq, %61, %81 : vector<1x256xf32>
    %c8_i32 = arith.constant 8 : i32
    %87 = vector.broadcast %c8_i32 : i32 to vector<1x256xi32>
    %88 = arith.select %86, %87, %85 : vector<1x256xi1>, vector<1x256xi32>
    %89 = arith.cmpf oeq, %60, %81 : vector<1x256xf32>
    %c7_i32 = arith.constant 7 : i32
    %90 = vector.broadcast %c7_i32 : i32 to vector<1x256xi32>
    %91 = arith.select %89, %90, %88 : vector<1x256xi1>, vector<1x256xi32>
    %92 = arith.cmpf oeq, %59, %81 : vector<1x256xf32>
    %c6_i32 = arith.constant 6 : i32
    %93 = vector.broadcast %c6_i32 : i32 to vector<1x256xi32>
    %94 = arith.select %92, %93, %91 : vector<1x256xi1>, vector<1x256xi32>
    %95 = arith.cmpf oeq, %58, %81 : vector<1x256xf32>
    %c5_i32 = arith.constant 5 : i32
    %96 = vector.broadcast %c5_i32 : i32 to vector<1x256xi32>
    %97 = arith.select %95, %96, %94 : vector<1x256xi1>, vector<1x256xi32>
    %98 = arith.cmpf oeq, %57, %81 : vector<1x256xf32>
    %c4_i32 = arith.constant 4 : i32
    %99 = vector.broadcast %c4_i32 : i32 to vector<1x256xi32>
    %100 = arith.select %98, %99, %97 : vector<1x256xi1>, vector<1x256xi32>
    %101 = arith.cmpf oeq, %56, %81 : vector<1x256xf32>
    %c3_i32 = arith.constant 3 : i32
    %102 = vector.broadcast %c3_i32 : i32 to vector<1x256xi32>
    %103 = arith.select %101, %102, %100 : vector<1x256xi1>, vector<1x256xi32>
    %104 = arith.cmpf oeq, %55, %81 : vector<1x256xf32>
    %c2_i32 = arith.constant 2 : i32
    %105 = vector.broadcast %c2_i32 : i32 to vector<1x256xi32>
    %106 = arith.select %104, %105, %103 : vector<1x256xi1>, vector<1x256xi32>
    %107 = arith.cmpf oeq, %54, %81 : vector<1x256xf32>
    %c1_i32 = arith.constant 1 : i32
    %108 = vector.broadcast %c1_i32 : i32 to vector<1x256xi32>
    %109 = arith.select %107, %108, %106 : vector<1x256xi1>, vector<1x256xi32>
    %110 = arith.cmpf oeq, %53, %81 : vector<1x256xf32>
    %c0_i32 = arith.constant 0 : i32
    %111 = vector.broadcast %c0_i32 : i32 to vector<1x256xi32>
    %112 = arith.select %110, %111, %109 : vector<1x256xi1>, vector<1x256xi32>
    %c0_i32_14 = arith.constant 0 : i32
    %113 = vector.broadcast %c0_i32_14 : i32 to vector<1x256xi32>
    %114 = arith.cmpf oeq, %53, %81 : vector<1x256xf32>
    %c0_i32_15 = arith.constant 0 : i32
    %115 = vector.broadcast %c0_i32_15 : i32 to vector<1x256xi32>
    %116 = arith.cmpi eq, %113, %115 : vector<1x256xi32>
    %117 = arith.andi %114, %116 : vector<1x256xi1>
    %cst_16 = arith.constant -1.000000e+30 : f32
    %118 = vector.broadcast %cst_16 : f32 to vector<1x256xf32>
    %119 = arith.select %117, %118, %53 : vector<1x256xi1>, vector<1x256xf32>
    %120 = arith.extui %117 : vector<1x256xi1> to vector<1x256xi32>
    %121 = arith.addi %113, %120 : vector<1x256xi32>
    %122 = arith.cmpf oeq, %54, %81 : vector<1x256xf32>
    %c0_i32_17 = arith.constant 0 : i32
    %123 = vector.broadcast %c0_i32_17 : i32 to vector<1x256xi32>
    %124 = arith.cmpi eq, %121, %123 : vector<1x256xi32>
    %125 = arith.andi %122, %124 : vector<1x256xi1>
    %cst_18 = arith.constant -1.000000e+30 : f32
    %126 = vector.broadcast %cst_18 : f32 to vector<1x256xf32>
    %127 = arith.select %125, %126, %54 : vector<1x256xi1>, vector<1x256xf32>
    %128 = arith.extui %125 : vector<1x256xi1> to vector<1x256xi32>
    %129 = arith.addi %121, %128 : vector<1x256xi32>
    %130 = arith.cmpf oeq, %55, %81 : vector<1x256xf32>
    %c0_i32_19 = arith.constant 0 : i32
    %131 = vector.broadcast %c0_i32_19 : i32 to vector<1x256xi32>
    %132 = arith.cmpi eq, %129, %131 : vector<1x256xi32>
    %133 = arith.andi %130, %132 : vector<1x256xi1>
    %cst_20 = arith.constant -1.000000e+30 : f32
    %134 = vector.broadcast %cst_20 : f32 to vector<1x256xf32>
    %135 = arith.select %133, %134, %55 : vector<1x256xi1>, vector<1x256xf32>
    %136 = arith.extui %133 : vector<1x256xi1> to vector<1x256xi32>
    %137 = arith.addi %129, %136 : vector<1x256xi32>
    %138 = arith.cmpf oeq, %56, %81 : vector<1x256xf32>
    %c0_i32_21 = arith.constant 0 : i32
    %139 = vector.broadcast %c0_i32_21 : i32 to vector<1x256xi32>
    %140 = arith.cmpi eq, %137, %139 : vector<1x256xi32>
    %141 = arith.andi %138, %140 : vector<1x256xi1>
    %cst_22 = arith.constant -1.000000e+30 : f32
    %142 = vector.broadcast %cst_22 : f32 to vector<1x256xf32>
    %143 = arith.select %141, %142, %56 : vector<1x256xi1>, vector<1x256xf32>
    %144 = arith.extui %141 : vector<1x256xi1> to vector<1x256xi32>
    %145 = arith.addi %137, %144 : vector<1x256xi32>
    %146 = arith.cmpf oeq, %57, %81 : vector<1x256xf32>
    %c0_i32_23 = arith.constant 0 : i32
    %147 = vector.broadcast %c0_i32_23 : i32 to vector<1x256xi32>
    %148 = arith.cmpi eq, %145, %147 : vector<1x256xi32>
    %149 = arith.andi %146, %148 : vector<1x256xi1>
    %cst_24 = arith.constant -1.000000e+30 : f32
    %150 = vector.broadcast %cst_24 : f32 to vector<1x256xf32>
    %151 = arith.select %149, %150, %57 : vector<1x256xi1>, vector<1x256xf32>
    %152 = arith.extui %149 : vector<1x256xi1> to vector<1x256xi32>
    %153 = arith.addi %145, %152 : vector<1x256xi32>
    %154 = arith.cmpf oeq, %58, %81 : vector<1x256xf32>
    %c0_i32_25 = arith.constant 0 : i32
    %155 = vector.broadcast %c0_i32_25 : i32 to vector<1x256xi32>
    %156 = arith.cmpi eq, %153, %155 : vector<1x256xi32>
    %157 = arith.andi %154, %156 : vector<1x256xi1>
    %cst_26 = arith.constant -1.000000e+30 : f32
    %158 = vector.broadcast %cst_26 : f32 to vector<1x256xf32>
    %159 = arith.select %157, %158, %58 : vector<1x256xi1>, vector<1x256xf32>
    %160 = arith.extui %157 : vector<1x256xi1> to vector<1x256xi32>
    %161 = arith.addi %153, %160 : vector<1x256xi32>
    %162 = arith.cmpf oeq, %59, %81 : vector<1x256xf32>
    %c0_i32_27 = arith.constant 0 : i32
    %163 = vector.broadcast %c0_i32_27 : i32 to vector<1x256xi32>
    %164 = arith.cmpi eq, %161, %163 : vector<1x256xi32>
    %165 = arith.andi %162, %164 : vector<1x256xi1>
    %cst_28 = arith.constant -1.000000e+30 : f32
    %166 = vector.broadcast %cst_28 : f32 to vector<1x256xf32>
    %167 = arith.select %165, %166, %59 : vector<1x256xi1>, vector<1x256xf32>
    %168 = arith.extui %165 : vector<1x256xi1> to vector<1x256xi32>
    %169 = arith.addi %161, %168 : vector<1x256xi32>
    %170 = arith.cmpf oeq, %60, %81 : vector<1x256xf32>
    %c0_i32_29 = arith.constant 0 : i32
    %171 = vector.broadcast %c0_i32_29 : i32 to vector<1x256xi32>
    %172 = arith.cmpi eq, %169, %171 : vector<1x256xi32>
    %173 = arith.andi %170, %172 : vector<1x256xi1>
    %cst_30 = arith.constant -1.000000e+30 : f32
    %174 = vector.broadcast %cst_30 : f32 to vector<1x256xf32>
    %175 = arith.select %173, %174, %60 : vector<1x256xi1>, vector<1x256xf32>
    %176 = arith.extui %173 : vector<1x256xi1> to vector<1x256xi32>
    %177 = arith.addi %169, %176 : vector<1x256xi32>
    %178 = arith.cmpf oeq, %61, %81 : vector<1x256xf32>
    %c0_i32_31 = arith.constant 0 : i32
    %179 = vector.broadcast %c0_i32_31 : i32 to vector<1x256xi32>
    %180 = arith.cmpi eq, %177, %179 : vector<1x256xi32>
    %181 = arith.andi %178, %180 : vector<1x256xi1>
    %cst_32 = arith.constant -1.000000e+30 : f32
    %182 = vector.broadcast %cst_32 : f32 to vector<1x256xf32>
    %183 = arith.select %181, %182, %61 : vector<1x256xi1>, vector<1x256xf32>
    %184 = arith.extui %181 : vector<1x256xi1> to vector<1x256xi32>
    %185 = arith.addi %177, %184 : vector<1x256xi32>
    %186 = arith.cmpf oeq, %62, %81 : vector<1x256xf32>
    %c0_i32_33 = arith.constant 0 : i32
    %187 = vector.broadcast %c0_i32_33 : i32 to vector<1x256xi32>
    %188 = arith.cmpi eq, %185, %187 : vector<1x256xi32>
    %189 = arith.andi %186, %188 : vector<1x256xi1>
    %cst_34 = arith.constant -1.000000e+30 : f32
    %190 = vector.broadcast %cst_34 : f32 to vector<1x256xf32>
    %191 = arith.select %189, %190, %62 : vector<1x256xi1>, vector<1x256xf32>
    %192 = arith.maximumf %119, %127 : vector<1x256xf32>
    %193 = arith.maximumf %192, %135 : vector<1x256xf32>
    %194 = arith.maximumf %193, %143 : vector<1x256xf32>
    %195 = arith.maximumf %194, %151 : vector<1x256xf32>
    %196 = arith.maximumf %195, %159 : vector<1x256xf32>
    %197 = arith.maximumf %196, %167 : vector<1x256xf32>
    %198 = arith.maximumf %197, %175 : vector<1x256xf32>
    %199 = arith.maximumf %198, %183 : vector<1x256xf32>
    %200 = arith.maximumf %199, %191 : vector<1x256xf32>
    %c0_i32_35 = arith.constant 0 : i32
    %201 = vector.broadcast %c0_i32_35 : i32 to vector<1x256xi32>
    %202 = arith.cmpf oeq, %119, %200 : vector<1x256xf32>
    %c0_i32_36 = arith.constant 0 : i32
    %203 = vector.broadcast %c0_i32_36 : i32 to vector<1x256xi32>
    %204 = arith.cmpi eq, %201, %203 : vector<1x256xi32>
    %205 = arith.andi %202, %204 : vector<1x256xi1>
    %cst_37 = arith.constant -1.000000e+30 : f32
    %206 = vector.broadcast %cst_37 : f32 to vector<1x256xf32>
    %207 = arith.select %205, %206, %119 : vector<1x256xi1>, vector<1x256xf32>
    %208 = arith.extui %205 : vector<1x256xi1> to vector<1x256xi32>
    %209 = arith.addi %201, %208 : vector<1x256xi32>
    %210 = arith.cmpf oeq, %127, %200 : vector<1x256xf32>
    %c0_i32_38 = arith.constant 0 : i32
    %211 = vector.broadcast %c0_i32_38 : i32 to vector<1x256xi32>
    %212 = arith.cmpi eq, %209, %211 : vector<1x256xi32>
    %213 = arith.andi %210, %212 : vector<1x256xi1>
    %cst_39 = arith.constant -1.000000e+30 : f32
    %214 = vector.broadcast %cst_39 : f32 to vector<1x256xf32>
    %215 = arith.select %213, %214, %127 : vector<1x256xi1>, vector<1x256xf32>
    %216 = arith.extui %213 : vector<1x256xi1> to vector<1x256xi32>
    %217 = arith.addi %209, %216 : vector<1x256xi32>
    %218 = arith.cmpf oeq, %135, %200 : vector<1x256xf32>
    %c0_i32_40 = arith.constant 0 : i32
    %219 = vector.broadcast %c0_i32_40 : i32 to vector<1x256xi32>
    %220 = arith.cmpi eq, %217, %219 : vector<1x256xi32>
    %221 = arith.andi %218, %220 : vector<1x256xi1>
    %cst_41 = arith.constant -1.000000e+30 : f32
    %222 = vector.broadcast %cst_41 : f32 to vector<1x256xf32>
    %223 = arith.select %221, %222, %135 : vector<1x256xi1>, vector<1x256xf32>
    %224 = arith.extui %221 : vector<1x256xi1> to vector<1x256xi32>
    %225 = arith.addi %217, %224 : vector<1x256xi32>
    %226 = arith.cmpf oeq, %143, %200 : vector<1x256xf32>
    %c0_i32_42 = arith.constant 0 : i32
    %227 = vector.broadcast %c0_i32_42 : i32 to vector<1x256xi32>
    %228 = arith.cmpi eq, %225, %227 : vector<1x256xi32>
    %229 = arith.andi %226, %228 : vector<1x256xi1>
    %cst_43 = arith.constant -1.000000e+30 : f32
    %230 = vector.broadcast %cst_43 : f32 to vector<1x256xf32>
    %231 = arith.select %229, %230, %143 : vector<1x256xi1>, vector<1x256xf32>
    %232 = arith.extui %229 : vector<1x256xi1> to vector<1x256xi32>
    %233 = arith.addi %225, %232 : vector<1x256xi32>
    %234 = arith.cmpf oeq, %151, %200 : vector<1x256xf32>
    %c0_i32_44 = arith.constant 0 : i32
    %235 = vector.broadcast %c0_i32_44 : i32 to vector<1x256xi32>
    %236 = arith.cmpi eq, %233, %235 : vector<1x256xi32>
    %237 = arith.andi %234, %236 : vector<1x256xi1>
    %cst_45 = arith.constant -1.000000e+30 : f32
    %238 = vector.broadcast %cst_45 : f32 to vector<1x256xf32>
    %239 = arith.select %237, %238, %151 : vector<1x256xi1>, vector<1x256xf32>
    %240 = arith.extui %237 : vector<1x256xi1> to vector<1x256xi32>
    %241 = arith.addi %233, %240 : vector<1x256xi32>
    %242 = arith.cmpf oeq, %159, %200 : vector<1x256xf32>
    %c0_i32_46 = arith.constant 0 : i32
    %243 = vector.broadcast %c0_i32_46 : i32 to vector<1x256xi32>
    %244 = arith.cmpi eq, %241, %243 : vector<1x256xi32>
    %245 = arith.andi %242, %244 : vector<1x256xi1>
    %cst_47 = arith.constant -1.000000e+30 : f32
    %246 = vector.broadcast %cst_47 : f32 to vector<1x256xf32>
    %247 = arith.select %245, %246, %159 : vector<1x256xi1>, vector<1x256xf32>
    %248 = arith.extui %245 : vector<1x256xi1> to vector<1x256xi32>
    %249 = arith.addi %241, %248 : vector<1x256xi32>
    %250 = arith.cmpf oeq, %167, %200 : vector<1x256xf32>
    %c0_i32_48 = arith.constant 0 : i32
    %251 = vector.broadcast %c0_i32_48 : i32 to vector<1x256xi32>
    %252 = arith.cmpi eq, %249, %251 : vector<1x256xi32>
    %253 = arith.andi %250, %252 : vector<1x256xi1>
    %cst_49 = arith.constant -1.000000e+30 : f32
    %254 = vector.broadcast %cst_49 : f32 to vector<1x256xf32>
    %255 = arith.select %253, %254, %167 : vector<1x256xi1>, vector<1x256xf32>
    %256 = arith.extui %253 : vector<1x256xi1> to vector<1x256xi32>
    %257 = arith.addi %249, %256 : vector<1x256xi32>
    %258 = arith.cmpf oeq, %175, %200 : vector<1x256xf32>
    %c0_i32_50 = arith.constant 0 : i32
    %259 = vector.broadcast %c0_i32_50 : i32 to vector<1x256xi32>
    %260 = arith.cmpi eq, %257, %259 : vector<1x256xi32>
    %261 = arith.andi %258, %260 : vector<1x256xi1>
    %cst_51 = arith.constant -1.000000e+30 : f32
    %262 = vector.broadcast %cst_51 : f32 to vector<1x256xf32>
    %263 = arith.select %261, %262, %175 : vector<1x256xi1>, vector<1x256xf32>
    %264 = arith.extui %261 : vector<1x256xi1> to vector<1x256xi32>
    %265 = arith.addi %257, %264 : vector<1x256xi32>
    %266 = arith.cmpf oeq, %183, %200 : vector<1x256xf32>
    %c0_i32_52 = arith.constant 0 : i32
    %267 = vector.broadcast %c0_i32_52 : i32 to vector<1x256xi32>
    %268 = arith.cmpi eq, %265, %267 : vector<1x256xi32>
    %269 = arith.andi %266, %268 : vector<1x256xi1>
    %cst_53 = arith.constant -1.000000e+30 : f32
    %270 = vector.broadcast %cst_53 : f32 to vector<1x256xf32>
    %271 = arith.select %269, %270, %183 : vector<1x256xi1>, vector<1x256xf32>
    %272 = arith.extui %269 : vector<1x256xi1> to vector<1x256xi32>
    %273 = arith.addi %265, %272 : vector<1x256xi32>
    %274 = arith.cmpf oeq, %191, %200 : vector<1x256xf32>
    %c0_i32_54 = arith.constant 0 : i32
    %275 = vector.broadcast %c0_i32_54 : i32 to vector<1x256xi32>
    %276 = arith.cmpi eq, %273, %275 : vector<1x256xi32>
    %277 = arith.andi %274, %276 : vector<1x256xi1>
    %cst_55 = arith.constant -1.000000e+30 : f32
    %278 = vector.broadcast %cst_55 : f32 to vector<1x256xf32>
    %279 = arith.select %277, %278, %191 : vector<1x256xi1>, vector<1x256xf32>
    %280 = arith.maximumf %207, %215 : vector<1x256xf32>
    %281 = arith.maximumf %280, %223 : vector<1x256xf32>
    %282 = arith.maximumf %281, %231 : vector<1x256xf32>
    %283 = arith.maximumf %282, %239 : vector<1x256xf32>
    %284 = arith.maximumf %283, %247 : vector<1x256xf32>
    %285 = arith.maximumf %284, %255 : vector<1x256xf32>
    %286 = arith.maximumf %285, %263 : vector<1x256xf32>
    %287 = arith.maximumf %286, %271 : vector<1x256xf32>
    %288 = arith.maximumf %287, %279 : vector<1x256xf32>
    %c0_i32_56 = arith.constant 0 : i32
    %289 = vector.broadcast %c0_i32_56 : i32 to vector<1x256xi32>
    %290 = arith.cmpf oeq, %207, %288 : vector<1x256xf32>
    %c0_i32_57 = arith.constant 0 : i32
    %291 = vector.broadcast %c0_i32_57 : i32 to vector<1x256xi32>
    %292 = arith.cmpi eq, %289, %291 : vector<1x256xi32>
    %293 = arith.andi %290, %292 : vector<1x256xi1>
    %cst_58 = arith.constant -1.000000e+30 : f32
    %294 = vector.broadcast %cst_58 : f32 to vector<1x256xf32>
    %295 = arith.select %293, %294, %207 : vector<1x256xi1>, vector<1x256xf32>
    %296 = arith.extui %293 : vector<1x256xi1> to vector<1x256xi32>
    %297 = arith.addi %289, %296 : vector<1x256xi32>
    %298 = arith.cmpf oeq, %215, %288 : vector<1x256xf32>
    %c0_i32_59 = arith.constant 0 : i32
    %299 = vector.broadcast %c0_i32_59 : i32 to vector<1x256xi32>
    %300 = arith.cmpi eq, %297, %299 : vector<1x256xi32>
    %301 = arith.andi %298, %300 : vector<1x256xi1>
    %cst_60 = arith.constant -1.000000e+30 : f32
    %302 = vector.broadcast %cst_60 : f32 to vector<1x256xf32>
    %303 = arith.select %301, %302, %215 : vector<1x256xi1>, vector<1x256xf32>
    %304 = arith.extui %301 : vector<1x256xi1> to vector<1x256xi32>
    %305 = arith.addi %297, %304 : vector<1x256xi32>
    %306 = arith.cmpf oeq, %223, %288 : vector<1x256xf32>
    %c0_i32_61 = arith.constant 0 : i32
    %307 = vector.broadcast %c0_i32_61 : i32 to vector<1x256xi32>
    %308 = arith.cmpi eq, %305, %307 : vector<1x256xi32>
    %309 = arith.andi %306, %308 : vector<1x256xi1>
    %cst_62 = arith.constant -1.000000e+30 : f32
    %310 = vector.broadcast %cst_62 : f32 to vector<1x256xf32>
    %311 = arith.select %309, %310, %223 : vector<1x256xi1>, vector<1x256xf32>
    %312 = arith.extui %309 : vector<1x256xi1> to vector<1x256xi32>
    %313 = arith.addi %305, %312 : vector<1x256xi32>
    %314 = arith.cmpf oeq, %231, %288 : vector<1x256xf32>
    %c0_i32_63 = arith.constant 0 : i32
    %315 = vector.broadcast %c0_i32_63 : i32 to vector<1x256xi32>
    %316 = arith.cmpi eq, %313, %315 : vector<1x256xi32>
    %317 = arith.andi %314, %316 : vector<1x256xi1>
    %cst_64 = arith.constant -1.000000e+30 : f32
    %318 = vector.broadcast %cst_64 : f32 to vector<1x256xf32>
    %319 = arith.select %317, %318, %231 : vector<1x256xi1>, vector<1x256xf32>
    %320 = arith.extui %317 : vector<1x256xi1> to vector<1x256xi32>
    %321 = arith.addi %313, %320 : vector<1x256xi32>
    %322 = arith.cmpf oeq, %239, %288 : vector<1x256xf32>
    %c0_i32_65 = arith.constant 0 : i32
    %323 = vector.broadcast %c0_i32_65 : i32 to vector<1x256xi32>
    %324 = arith.cmpi eq, %321, %323 : vector<1x256xi32>
    %325 = arith.andi %322, %324 : vector<1x256xi1>
    %cst_66 = arith.constant -1.000000e+30 : f32
    %326 = vector.broadcast %cst_66 : f32 to vector<1x256xf32>
    %327 = arith.select %325, %326, %239 : vector<1x256xi1>, vector<1x256xf32>
    %328 = arith.extui %325 : vector<1x256xi1> to vector<1x256xi32>
    %329 = arith.addi %321, %328 : vector<1x256xi32>
    %330 = arith.cmpf oeq, %247, %288 : vector<1x256xf32>
    %c0_i32_67 = arith.constant 0 : i32
    %331 = vector.broadcast %c0_i32_67 : i32 to vector<1x256xi32>
    %332 = arith.cmpi eq, %329, %331 : vector<1x256xi32>
    %333 = arith.andi %330, %332 : vector<1x256xi1>
    %cst_68 = arith.constant -1.000000e+30 : f32
    %334 = vector.broadcast %cst_68 : f32 to vector<1x256xf32>
    %335 = arith.select %333, %334, %247 : vector<1x256xi1>, vector<1x256xf32>
    %336 = arith.extui %333 : vector<1x256xi1> to vector<1x256xi32>
    %337 = arith.addi %329, %336 : vector<1x256xi32>
    %338 = arith.cmpf oeq, %255, %288 : vector<1x256xf32>
    %c0_i32_69 = arith.constant 0 : i32
    %339 = vector.broadcast %c0_i32_69 : i32 to vector<1x256xi32>
    %340 = arith.cmpi eq, %337, %339 : vector<1x256xi32>
    %341 = arith.andi %338, %340 : vector<1x256xi1>
    %cst_70 = arith.constant -1.000000e+30 : f32
    %342 = vector.broadcast %cst_70 : f32 to vector<1x256xf32>
    %343 = arith.select %341, %342, %255 : vector<1x256xi1>, vector<1x256xf32>
    %344 = arith.extui %341 : vector<1x256xi1> to vector<1x256xi32>
    %345 = arith.addi %337, %344 : vector<1x256xi32>
    %346 = arith.cmpf oeq, %263, %288 : vector<1x256xf32>
    %c0_i32_71 = arith.constant 0 : i32
    %347 = vector.broadcast %c0_i32_71 : i32 to vector<1x256xi32>
    %348 = arith.cmpi eq, %345, %347 : vector<1x256xi32>
    %349 = arith.andi %346, %348 : vector<1x256xi1>
    %cst_72 = arith.constant -1.000000e+30 : f32
    %350 = vector.broadcast %cst_72 : f32 to vector<1x256xf32>
    %351 = arith.select %349, %350, %263 : vector<1x256xi1>, vector<1x256xf32>
    %352 = arith.extui %349 : vector<1x256xi1> to vector<1x256xi32>
    %353 = arith.addi %345, %352 : vector<1x256xi32>
    %354 = arith.cmpf oeq, %271, %288 : vector<1x256xf32>
    %c0_i32_73 = arith.constant 0 : i32
    %355 = vector.broadcast %c0_i32_73 : i32 to vector<1x256xi32>
    %356 = arith.cmpi eq, %353, %355 : vector<1x256xi32>
    %357 = arith.andi %354, %356 : vector<1x256xi1>
    %cst_74 = arith.constant -1.000000e+30 : f32
    %358 = vector.broadcast %cst_74 : f32 to vector<1x256xf32>
    %359 = arith.select %357, %358, %271 : vector<1x256xi1>, vector<1x256xf32>
    %360 = arith.extui %357 : vector<1x256xi1> to vector<1x256xi32>
    %361 = arith.addi %353, %360 : vector<1x256xi32>
    %362 = arith.cmpf oeq, %279, %288 : vector<1x256xf32>
    %c0_i32_75 = arith.constant 0 : i32
    %363 = vector.broadcast %c0_i32_75 : i32 to vector<1x256xi32>
    %364 = arith.cmpi eq, %361, %363 : vector<1x256xi32>
    %365 = arith.andi %362, %364 : vector<1x256xi1>
    %cst_76 = arith.constant -1.000000e+30 : f32
    %366 = vector.broadcast %cst_76 : f32 to vector<1x256xf32>
    %367 = arith.select %365, %366, %279 : vector<1x256xi1>, vector<1x256xf32>
    %368 = arith.maximumf %295, %303 : vector<1x256xf32>
    %369 = arith.maximumf %368, %311 : vector<1x256xf32>
    %370 = arith.maximumf %369, %319 : vector<1x256xf32>
    %371 = arith.maximumf %370, %327 : vector<1x256xf32>
    %372 = arith.maximumf %371, %335 : vector<1x256xf32>
    %373 = arith.maximumf %372, %343 : vector<1x256xf32>
    %374 = arith.maximumf %373, %351 : vector<1x256xf32>
    %375 = arith.maximumf %374, %359 : vector<1x256xf32>
    %376 = arith.maximumf %375, %367 : vector<1x256xf32>
    %c0_i32_77 = arith.constant 0 : i32
    %377 = vector.broadcast %c0_i32_77 : i32 to vector<1x256xi32>
    %378 = arith.cmpf oeq, %295, %376 : vector<1x256xf32>
    %c0_i32_78 = arith.constant 0 : i32
    %379 = vector.broadcast %c0_i32_78 : i32 to vector<1x256xi32>
    %380 = arith.cmpi eq, %377, %379 : vector<1x256xi32>
    %381 = arith.andi %378, %380 : vector<1x256xi1>
    %cst_79 = arith.constant -1.000000e+30 : f32
    %382 = vector.broadcast %cst_79 : f32 to vector<1x256xf32>
    %383 = arith.select %381, %382, %295 : vector<1x256xi1>, vector<1x256xf32>
    %384 = arith.extui %381 : vector<1x256xi1> to vector<1x256xi32>
    %385 = arith.addi %377, %384 : vector<1x256xi32>
    %386 = arith.cmpf oeq, %303, %376 : vector<1x256xf32>
    %c0_i32_80 = arith.constant 0 : i32
    %387 = vector.broadcast %c0_i32_80 : i32 to vector<1x256xi32>
    %388 = arith.cmpi eq, %385, %387 : vector<1x256xi32>
    %389 = arith.andi %386, %388 : vector<1x256xi1>
    %cst_81 = arith.constant -1.000000e+30 : f32
    %390 = vector.broadcast %cst_81 : f32 to vector<1x256xf32>
    %391 = arith.select %389, %390, %303 : vector<1x256xi1>, vector<1x256xf32>
    %392 = arith.extui %389 : vector<1x256xi1> to vector<1x256xi32>
    %393 = arith.addi %385, %392 : vector<1x256xi32>
    %394 = arith.cmpf oeq, %311, %376 : vector<1x256xf32>
    %c0_i32_82 = arith.constant 0 : i32
    %395 = vector.broadcast %c0_i32_82 : i32 to vector<1x256xi32>
    %396 = arith.cmpi eq, %393, %395 : vector<1x256xi32>
    %397 = arith.andi %394, %396 : vector<1x256xi1>
    %cst_83 = arith.constant -1.000000e+30 : f32
    %398 = vector.broadcast %cst_83 : f32 to vector<1x256xf32>
    %399 = arith.select %397, %398, %311 : vector<1x256xi1>, vector<1x256xf32>
    %400 = arith.extui %397 : vector<1x256xi1> to vector<1x256xi32>
    %401 = arith.addi %393, %400 : vector<1x256xi32>
    %402 = arith.cmpf oeq, %319, %376 : vector<1x256xf32>
    %c0_i32_84 = arith.constant 0 : i32
    %403 = vector.broadcast %c0_i32_84 : i32 to vector<1x256xi32>
    %404 = arith.cmpi eq, %401, %403 : vector<1x256xi32>
    %405 = arith.andi %402, %404 : vector<1x256xi1>
    %cst_85 = arith.constant -1.000000e+30 : f32
    %406 = vector.broadcast %cst_85 : f32 to vector<1x256xf32>
    %407 = arith.select %405, %406, %319 : vector<1x256xi1>, vector<1x256xf32>
    %408 = arith.extui %405 : vector<1x256xi1> to vector<1x256xi32>
    %409 = arith.addi %401, %408 : vector<1x256xi32>
    %410 = arith.cmpf oeq, %327, %376 : vector<1x256xf32>
    %c0_i32_86 = arith.constant 0 : i32
    %411 = vector.broadcast %c0_i32_86 : i32 to vector<1x256xi32>
    %412 = arith.cmpi eq, %409, %411 : vector<1x256xi32>
    %413 = arith.andi %410, %412 : vector<1x256xi1>
    %cst_87 = arith.constant -1.000000e+30 : f32
    %414 = vector.broadcast %cst_87 : f32 to vector<1x256xf32>
    %415 = arith.select %413, %414, %327 : vector<1x256xi1>, vector<1x256xf32>
    %416 = arith.extui %413 : vector<1x256xi1> to vector<1x256xi32>
    %417 = arith.addi %409, %416 : vector<1x256xi32>
    %418 = arith.cmpf oeq, %335, %376 : vector<1x256xf32>
    %c0_i32_88 = arith.constant 0 : i32
    %419 = vector.broadcast %c0_i32_88 : i32 to vector<1x256xi32>
    %420 = arith.cmpi eq, %417, %419 : vector<1x256xi32>
    %421 = arith.andi %418, %420 : vector<1x256xi1>
    %cst_89 = arith.constant -1.000000e+30 : f32
    %422 = vector.broadcast %cst_89 : f32 to vector<1x256xf32>
    %423 = arith.select %421, %422, %335 : vector<1x256xi1>, vector<1x256xf32>
    %424 = arith.extui %421 : vector<1x256xi1> to vector<1x256xi32>
    %425 = arith.addi %417, %424 : vector<1x256xi32>
    %426 = arith.cmpf oeq, %343, %376 : vector<1x256xf32>
    %c0_i32_90 = arith.constant 0 : i32
    %427 = vector.broadcast %c0_i32_90 : i32 to vector<1x256xi32>
    %428 = arith.cmpi eq, %425, %427 : vector<1x256xi32>
    %429 = arith.andi %426, %428 : vector<1x256xi1>
    %cst_91 = arith.constant -1.000000e+30 : f32
    %430 = vector.broadcast %cst_91 : f32 to vector<1x256xf32>
    %431 = arith.select %429, %430, %343 : vector<1x256xi1>, vector<1x256xf32>
    %432 = arith.extui %429 : vector<1x256xi1> to vector<1x256xi32>
    %433 = arith.addi %425, %432 : vector<1x256xi32>
    %434 = arith.cmpf oeq, %351, %376 : vector<1x256xf32>
    %c0_i32_92 = arith.constant 0 : i32
    %435 = vector.broadcast %c0_i32_92 : i32 to vector<1x256xi32>
    %436 = arith.cmpi eq, %433, %435 : vector<1x256xi32>
    %437 = arith.andi %434, %436 : vector<1x256xi1>
    %cst_93 = arith.constant -1.000000e+30 : f32
    %438 = vector.broadcast %cst_93 : f32 to vector<1x256xf32>
    %439 = arith.select %437, %438, %351 : vector<1x256xi1>, vector<1x256xf32>
    %440 = arith.extui %437 : vector<1x256xi1> to vector<1x256xi32>
    %441 = arith.addi %433, %440 : vector<1x256xi32>
    %442 = arith.cmpf oeq, %359, %376 : vector<1x256xf32>
    %c0_i32_94 = arith.constant 0 : i32
    %443 = vector.broadcast %c0_i32_94 : i32 to vector<1x256xi32>
    %444 = arith.cmpi eq, %441, %443 : vector<1x256xi32>
    %445 = arith.andi %442, %444 : vector<1x256xi1>
    %cst_95 = arith.constant -1.000000e+30 : f32
    %446 = vector.broadcast %cst_95 : f32 to vector<1x256xf32>
    %447 = arith.select %445, %446, %359 : vector<1x256xi1>, vector<1x256xf32>
    %448 = arith.extui %445 : vector<1x256xi1> to vector<1x256xi32>
    %449 = arith.addi %441, %448 : vector<1x256xi32>
    %450 = arith.cmpf oeq, %367, %376 : vector<1x256xf32>
    %c0_i32_96 = arith.constant 0 : i32
    %451 = vector.broadcast %c0_i32_96 : i32 to vector<1x256xi32>
    %452 = arith.cmpi eq, %449, %451 : vector<1x256xi32>
    %453 = arith.andi %450, %452 : vector<1x256xi1>
    %cst_97 = arith.constant -1.000000e+30 : f32
    %454 = vector.broadcast %cst_97 : f32 to vector<1x256xf32>
    %455 = arith.select %453, %454, %367 : vector<1x256xi1>, vector<1x256xf32>
    %456 = arith.maximumf %383, %391 : vector<1x256xf32>
    %457 = arith.maximumf %456, %399 : vector<1x256xf32>
    %458 = arith.maximumf %457, %407 : vector<1x256xf32>
    %459 = arith.maximumf %458, %415 : vector<1x256xf32>
    %460 = arith.maximumf %459, %423 : vector<1x256xf32>
    %461 = arith.maximumf %460, %431 : vector<1x256xf32>
    %462 = arith.maximumf %461, %439 : vector<1x256xf32>
    %463 = arith.maximumf %462, %447 : vector<1x256xf32>
    %464 = arith.maximumf %463, %455 : vector<1x256xf32>
    %c0_i32_98 = arith.constant 0 : i32
    %465 = vector.broadcast %c0_i32_98 : i32 to vector<1x256xi32>
    %466 = arith.cmpf oeq, %383, %464 : vector<1x256xf32>
    %c0_i32_99 = arith.constant 0 : i32
    %467 = vector.broadcast %c0_i32_99 : i32 to vector<1x256xi32>
    %468 = arith.cmpi eq, %465, %467 : vector<1x256xi32>
    %469 = arith.andi %466, %468 : vector<1x256xi1>
    %cst_100 = arith.constant -1.000000e+30 : f32
    %470 = vector.broadcast %cst_100 : f32 to vector<1x256xf32>
    %471 = arith.select %469, %470, %383 : vector<1x256xi1>, vector<1x256xf32>
    %472 = arith.extui %469 : vector<1x256xi1> to vector<1x256xi32>
    %473 = arith.addi %465, %472 : vector<1x256xi32>
    %474 = arith.cmpf oeq, %391, %464 : vector<1x256xf32>
    %c0_i32_101 = arith.constant 0 : i32
    %475 = vector.broadcast %c0_i32_101 : i32 to vector<1x256xi32>
    %476 = arith.cmpi eq, %473, %475 : vector<1x256xi32>
    %477 = arith.andi %474, %476 : vector<1x256xi1>
    %cst_102 = arith.constant -1.000000e+30 : f32
    %478 = vector.broadcast %cst_102 : f32 to vector<1x256xf32>
    %479 = arith.select %477, %478, %391 : vector<1x256xi1>, vector<1x256xf32>
    %480 = arith.extui %477 : vector<1x256xi1> to vector<1x256xi32>
    %481 = arith.addi %473, %480 : vector<1x256xi32>
    %482 = arith.cmpf oeq, %399, %464 : vector<1x256xf32>
    %c0_i32_103 = arith.constant 0 : i32
    %483 = vector.broadcast %c0_i32_103 : i32 to vector<1x256xi32>
    %484 = arith.cmpi eq, %481, %483 : vector<1x256xi32>
    %485 = arith.andi %482, %484 : vector<1x256xi1>
    %cst_104 = arith.constant -1.000000e+30 : f32
    %486 = vector.broadcast %cst_104 : f32 to vector<1x256xf32>
    %487 = arith.select %485, %486, %399 : vector<1x256xi1>, vector<1x256xf32>
    %488 = arith.extui %485 : vector<1x256xi1> to vector<1x256xi32>
    %489 = arith.addi %481, %488 : vector<1x256xi32>
    %490 = arith.cmpf oeq, %407, %464 : vector<1x256xf32>
    %c0_i32_105 = arith.constant 0 : i32
    %491 = vector.broadcast %c0_i32_105 : i32 to vector<1x256xi32>
    %492 = arith.cmpi eq, %489, %491 : vector<1x256xi32>
    %493 = arith.andi %490, %492 : vector<1x256xi1>
    %cst_106 = arith.constant -1.000000e+30 : f32
    %494 = vector.broadcast %cst_106 : f32 to vector<1x256xf32>
    %495 = arith.select %493, %494, %407 : vector<1x256xi1>, vector<1x256xf32>
    %496 = arith.extui %493 : vector<1x256xi1> to vector<1x256xi32>
    %497 = arith.addi %489, %496 : vector<1x256xi32>
    %498 = arith.cmpf oeq, %415, %464 : vector<1x256xf32>
    %c0_i32_107 = arith.constant 0 : i32
    %499 = vector.broadcast %c0_i32_107 : i32 to vector<1x256xi32>
    %500 = arith.cmpi eq, %497, %499 : vector<1x256xi32>
    %501 = arith.andi %498, %500 : vector<1x256xi1>
    %cst_108 = arith.constant -1.000000e+30 : f32
    %502 = vector.broadcast %cst_108 : f32 to vector<1x256xf32>
    %503 = arith.select %501, %502, %415 : vector<1x256xi1>, vector<1x256xf32>
    %504 = arith.extui %501 : vector<1x256xi1> to vector<1x256xi32>
    %505 = arith.addi %497, %504 : vector<1x256xi32>
    %506 = arith.cmpf oeq, %423, %464 : vector<1x256xf32>
    %c0_i32_109 = arith.constant 0 : i32
    %507 = vector.broadcast %c0_i32_109 : i32 to vector<1x256xi32>
    %508 = arith.cmpi eq, %505, %507 : vector<1x256xi32>
    %509 = arith.andi %506, %508 : vector<1x256xi1>
    %cst_110 = arith.constant -1.000000e+30 : f32
    %510 = vector.broadcast %cst_110 : f32 to vector<1x256xf32>
    %511 = arith.select %509, %510, %423 : vector<1x256xi1>, vector<1x256xf32>
    %512 = arith.extui %509 : vector<1x256xi1> to vector<1x256xi32>
    %513 = arith.addi %505, %512 : vector<1x256xi32>
    %514 = arith.cmpf oeq, %431, %464 : vector<1x256xf32>
    %c0_i32_111 = arith.constant 0 : i32
    %515 = vector.broadcast %c0_i32_111 : i32 to vector<1x256xi32>
    %516 = arith.cmpi eq, %513, %515 : vector<1x256xi32>
    %517 = arith.andi %514, %516 : vector<1x256xi1>
    %cst_112 = arith.constant -1.000000e+30 : f32
    %518 = vector.broadcast %cst_112 : f32 to vector<1x256xf32>
    %519 = arith.select %517, %518, %431 : vector<1x256xi1>, vector<1x256xf32>
    %520 = arith.extui %517 : vector<1x256xi1> to vector<1x256xi32>
    %521 = arith.addi %513, %520 : vector<1x256xi32>
    %522 = arith.cmpf oeq, %439, %464 : vector<1x256xf32>
    %c0_i32_113 = arith.constant 0 : i32
    %523 = vector.broadcast %c0_i32_113 : i32 to vector<1x256xi32>
    %524 = arith.cmpi eq, %521, %523 : vector<1x256xi32>
    %525 = arith.andi %522, %524 : vector<1x256xi1>
    %cst_114 = arith.constant -1.000000e+30 : f32
    %526 = vector.broadcast %cst_114 : f32 to vector<1x256xf32>
    %527 = arith.select %525, %526, %439 : vector<1x256xi1>, vector<1x256xf32>
    %528 = arith.extui %525 : vector<1x256xi1> to vector<1x256xi32>
    %529 = arith.addi %521, %528 : vector<1x256xi32>
    %530 = arith.cmpf oeq, %447, %464 : vector<1x256xf32>
    %c0_i32_115 = arith.constant 0 : i32
    %531 = vector.broadcast %c0_i32_115 : i32 to vector<1x256xi32>
    %532 = arith.cmpi eq, %529, %531 : vector<1x256xi32>
    %533 = arith.andi %530, %532 : vector<1x256xi1>
    %cst_116 = arith.constant -1.000000e+30 : f32
    %534 = vector.broadcast %cst_116 : f32 to vector<1x256xf32>
    %535 = arith.select %533, %534, %447 : vector<1x256xi1>, vector<1x256xf32>
    %536 = arith.extui %533 : vector<1x256xi1> to vector<1x256xi32>
    %537 = arith.addi %529, %536 : vector<1x256xi32>
    %538 = arith.cmpf oeq, %455, %464 : vector<1x256xf32>
    %c0_i32_117 = arith.constant 0 : i32
    %539 = vector.broadcast %c0_i32_117 : i32 to vector<1x256xi32>
    %540 = arith.cmpi eq, %537, %539 : vector<1x256xi32>
    %541 = arith.andi %538, %540 : vector<1x256xi1>
    %cst_118 = arith.constant -1.000000e+30 : f32
    %542 = vector.broadcast %cst_118 : f32 to vector<1x256xf32>
    %543 = arith.select %541, %542, %455 : vector<1x256xi1>, vector<1x256xf32>
    %544 = arith.maximumf %471, %479 : vector<1x256xf32>
    %545 = arith.maximumf %544, %487 : vector<1x256xf32>
    %546 = arith.maximumf %545, %495 : vector<1x256xf32>
    %547 = arith.maximumf %546, %503 : vector<1x256xf32>
    %548 = arith.maximumf %547, %511 : vector<1x256xf32>
    %549 = arith.maximumf %548, %519 : vector<1x256xf32>
    %550 = arith.maximumf %549, %527 : vector<1x256xf32>
    %551 = arith.maximumf %550, %535 : vector<1x256xf32>
    %552 = arith.maximumf %551, %543 : vector<1x256xf32>
    %c0_i32_119 = arith.constant 0 : i32
    %553 = vector.broadcast %c0_i32_119 : i32 to vector<1x256xi32>
    %554 = arith.cmpf oeq, %471, %552 : vector<1x256xf32>
    %c0_i32_120 = arith.constant 0 : i32
    %555 = vector.broadcast %c0_i32_120 : i32 to vector<1x256xi32>
    %556 = arith.cmpi eq, %553, %555 : vector<1x256xi32>
    %557 = arith.andi %554, %556 : vector<1x256xi1>
    %cst_121 = arith.constant -1.000000e+30 : f32
    %558 = vector.broadcast %cst_121 : f32 to vector<1x256xf32>
    %559 = arith.select %557, %558, %471 : vector<1x256xi1>, vector<1x256xf32>
    %560 = arith.extui %557 : vector<1x256xi1> to vector<1x256xi32>
    %561 = arith.addi %553, %560 : vector<1x256xi32>
    %562 = arith.cmpf oeq, %479, %552 : vector<1x256xf32>
    %c0_i32_122 = arith.constant 0 : i32
    %563 = vector.broadcast %c0_i32_122 : i32 to vector<1x256xi32>
    %564 = arith.cmpi eq, %561, %563 : vector<1x256xi32>
    %565 = arith.andi %562, %564 : vector<1x256xi1>
    %cst_123 = arith.constant -1.000000e+30 : f32
    %566 = vector.broadcast %cst_123 : f32 to vector<1x256xf32>
    %567 = arith.select %565, %566, %479 : vector<1x256xi1>, vector<1x256xf32>
    %568 = arith.extui %565 : vector<1x256xi1> to vector<1x256xi32>
    %569 = arith.addi %561, %568 : vector<1x256xi32>
    %570 = arith.cmpf oeq, %487, %552 : vector<1x256xf32>
    %c0_i32_124 = arith.constant 0 : i32
    %571 = vector.broadcast %c0_i32_124 : i32 to vector<1x256xi32>
    %572 = arith.cmpi eq, %569, %571 : vector<1x256xi32>
    %573 = arith.andi %570, %572 : vector<1x256xi1>
    %cst_125 = arith.constant -1.000000e+30 : f32
    %574 = vector.broadcast %cst_125 : f32 to vector<1x256xf32>
    %575 = arith.select %573, %574, %487 : vector<1x256xi1>, vector<1x256xf32>
    %576 = arith.extui %573 : vector<1x256xi1> to vector<1x256xi32>
    %577 = arith.addi %569, %576 : vector<1x256xi32>
    %578 = arith.cmpf oeq, %495, %552 : vector<1x256xf32>
    %c0_i32_126 = arith.constant 0 : i32
    %579 = vector.broadcast %c0_i32_126 : i32 to vector<1x256xi32>
    %580 = arith.cmpi eq, %577, %579 : vector<1x256xi32>
    %581 = arith.andi %578, %580 : vector<1x256xi1>
    %cst_127 = arith.constant -1.000000e+30 : f32
    %582 = vector.broadcast %cst_127 : f32 to vector<1x256xf32>
    %583 = arith.select %581, %582, %495 : vector<1x256xi1>, vector<1x256xf32>
    %584 = arith.extui %581 : vector<1x256xi1> to vector<1x256xi32>
    %585 = arith.addi %577, %584 : vector<1x256xi32>
    %586 = arith.cmpf oeq, %503, %552 : vector<1x256xf32>
    %c0_i32_128 = arith.constant 0 : i32
    %587 = vector.broadcast %c0_i32_128 : i32 to vector<1x256xi32>
    %588 = arith.cmpi eq, %585, %587 : vector<1x256xi32>
    %589 = arith.andi %586, %588 : vector<1x256xi1>
    %cst_129 = arith.constant -1.000000e+30 : f32
    %590 = vector.broadcast %cst_129 : f32 to vector<1x256xf32>
    %591 = arith.select %589, %590, %503 : vector<1x256xi1>, vector<1x256xf32>
    %592 = arith.extui %589 : vector<1x256xi1> to vector<1x256xi32>
    %593 = arith.addi %585, %592 : vector<1x256xi32>
    %594 = arith.cmpf oeq, %511, %552 : vector<1x256xf32>
    %c0_i32_130 = arith.constant 0 : i32
    %595 = vector.broadcast %c0_i32_130 : i32 to vector<1x256xi32>
    %596 = arith.cmpi eq, %593, %595 : vector<1x256xi32>
    %597 = arith.andi %594, %596 : vector<1x256xi1>
    %cst_131 = arith.constant -1.000000e+30 : f32
    %598 = vector.broadcast %cst_131 : f32 to vector<1x256xf32>
    %599 = arith.select %597, %598, %511 : vector<1x256xi1>, vector<1x256xf32>
    %600 = arith.extui %597 : vector<1x256xi1> to vector<1x256xi32>
    %601 = arith.addi %593, %600 : vector<1x256xi32>
    %602 = arith.cmpf oeq, %519, %552 : vector<1x256xf32>
    %c0_i32_132 = arith.constant 0 : i32
    %603 = vector.broadcast %c0_i32_132 : i32 to vector<1x256xi32>
    %604 = arith.cmpi eq, %601, %603 : vector<1x256xi32>
    %605 = arith.andi %602, %604 : vector<1x256xi1>
    %cst_133 = arith.constant -1.000000e+30 : f32
    %606 = vector.broadcast %cst_133 : f32 to vector<1x256xf32>
    %607 = arith.select %605, %606, %519 : vector<1x256xi1>, vector<1x256xf32>
    %608 = arith.extui %605 : vector<1x256xi1> to vector<1x256xi32>
    %609 = arith.addi %601, %608 : vector<1x256xi32>
    %610 = arith.cmpf oeq, %527, %552 : vector<1x256xf32>
    %c0_i32_134 = arith.constant 0 : i32
    %611 = vector.broadcast %c0_i32_134 : i32 to vector<1x256xi32>
    %612 = arith.cmpi eq, %609, %611 : vector<1x256xi32>
    %613 = arith.andi %610, %612 : vector<1x256xi1>
    %cst_135 = arith.constant -1.000000e+30 : f32
    %614 = vector.broadcast %cst_135 : f32 to vector<1x256xf32>
    %615 = arith.select %613, %614, %527 : vector<1x256xi1>, vector<1x256xf32>
    %616 = arith.extui %613 : vector<1x256xi1> to vector<1x256xi32>
    %617 = arith.addi %609, %616 : vector<1x256xi32>
    %618 = arith.cmpf oeq, %535, %552 : vector<1x256xf32>
    %c0_i32_136 = arith.constant 0 : i32
    %619 = vector.broadcast %c0_i32_136 : i32 to vector<1x256xi32>
    %620 = arith.cmpi eq, %617, %619 : vector<1x256xi32>
    %621 = arith.andi %618, %620 : vector<1x256xi1>
    %cst_137 = arith.constant -1.000000e+30 : f32
    %622 = vector.broadcast %cst_137 : f32 to vector<1x256xf32>
    %623 = arith.select %621, %622, %535 : vector<1x256xi1>, vector<1x256xf32>
    %624 = arith.extui %621 : vector<1x256xi1> to vector<1x256xi32>
    %625 = arith.addi %617, %624 : vector<1x256xi32>
    %626 = arith.cmpf oeq, %543, %552 : vector<1x256xf32>
    %c0_i32_138 = arith.constant 0 : i32
    %627 = vector.broadcast %c0_i32_138 : i32 to vector<1x256xi32>
    %628 = arith.cmpi eq, %625, %627 : vector<1x256xi32>
    %629 = arith.andi %626, %628 : vector<1x256xi1>
    %cst_139 = arith.constant -1.000000e+30 : f32
    %630 = vector.broadcast %cst_139 : f32 to vector<1x256xf32>
    %631 = arith.select %629, %630, %543 : vector<1x256xi1>, vector<1x256xf32>
    %632 = arith.maximumf %559, %567 : vector<1x256xf32>
    %633 = arith.maximumf %632, %575 : vector<1x256xf32>
    %634 = arith.maximumf %633, %583 : vector<1x256xf32>
    %635 = arith.maximumf %634, %591 : vector<1x256xf32>
    %636 = arith.maximumf %635, %599 : vector<1x256xf32>
    %637 = arith.maximumf %636, %607 : vector<1x256xf32>
    %638 = arith.maximumf %637, %615 : vector<1x256xf32>
    %639 = arith.maximumf %638, %623 : vector<1x256xf32>
    %640 = arith.maximumf %639, %631 : vector<1x256xf32>
    %641 = arith.minimumf %53, %54 : vector<1x256xf32>
    %642 = arith.minimumf %641, %55 : vector<1x256xf32>
    %643 = arith.minimumf %642, %56 : vector<1x256xf32>
    %644 = arith.minimumf %643, %57 : vector<1x256xf32>
    %645 = arith.minimumf %644, %58 : vector<1x256xf32>
    %646 = arith.minimumf %645, %59 : vector<1x256xf32>
    %647 = arith.minimumf %646, %60 : vector<1x256xf32>
    %648 = arith.minimumf %647, %61 : vector<1x256xf32>
    %649 = arith.minimumf %648, %62 : vector<1x256xf32>
    %cst_140 = arith.constant 0.000000e+00 : f32
    %650 = vector.broadcast %cst_140 : f32 to vector<1x256xf32>
    %cst_141 = arith.constant 0.000000e+00 : f32
    %651 = vector.broadcast %cst_141 : f32 to vector<1x256xf32>
    %c0_i32_142 = arith.constant 0 : i32
    %652 = vector.broadcast %c0_i32_142 : i32 to vector<1x256xi32>
    %653 = arith.cmpi eq, %10, %652 : vector<1x256xi32>
    %654 = arith.select %653, %53, %650 : vector<1x256xi1>, vector<1x256xf32>
    %c0_i32_143 = arith.constant 0 : i32
    %655 = vector.broadcast %c0_i32_143 : i32 to vector<1x256xi32>
    %656 = arith.cmpi eq, %11, %655 : vector<1x256xi32>
    %657 = arith.select %656, %53, %651 : vector<1x256xi1>, vector<1x256xf32>
    %c1_i32_144 = arith.constant 1 : i32
    %658 = vector.broadcast %c1_i32_144 : i32 to vector<1x256xi32>
    %659 = arith.cmpi eq, %10, %658 : vector<1x256xi32>
    %660 = arith.select %659, %54, %654 : vector<1x256xi1>, vector<1x256xf32>
    %c1_i32_145 = arith.constant 1 : i32
    %661 = vector.broadcast %c1_i32_145 : i32 to vector<1x256xi32>
    %662 = arith.cmpi eq, %11, %661 : vector<1x256xi32>
    %663 = arith.select %662, %54, %657 : vector<1x256xi1>, vector<1x256xf32>
    %c2_i32_146 = arith.constant 2 : i32
    %664 = vector.broadcast %c2_i32_146 : i32 to vector<1x256xi32>
    %665 = arith.cmpi eq, %10, %664 : vector<1x256xi32>
    %666 = arith.select %665, %55, %660 : vector<1x256xi1>, vector<1x256xf32>
    %c2_i32_147 = arith.constant 2 : i32
    %667 = vector.broadcast %c2_i32_147 : i32 to vector<1x256xi32>
    %668 = arith.cmpi eq, %11, %667 : vector<1x256xi32>
    %669 = arith.select %668, %55, %663 : vector<1x256xi1>, vector<1x256xf32>
    %c3_i32_148 = arith.constant 3 : i32
    %670 = vector.broadcast %c3_i32_148 : i32 to vector<1x256xi32>
    %671 = arith.cmpi eq, %10, %670 : vector<1x256xi32>
    %672 = arith.select %671, %56, %666 : vector<1x256xi1>, vector<1x256xf32>
    %c3_i32_149 = arith.constant 3 : i32
    %673 = vector.broadcast %c3_i32_149 : i32 to vector<1x256xi32>
    %674 = arith.cmpi eq, %11, %673 : vector<1x256xi32>
    %675 = arith.select %674, %56, %669 : vector<1x256xi1>, vector<1x256xf32>
    %c4_i32_150 = arith.constant 4 : i32
    %676 = vector.broadcast %c4_i32_150 : i32 to vector<1x256xi32>
    %677 = arith.cmpi eq, %10, %676 : vector<1x256xi32>
    %678 = arith.select %677, %57, %672 : vector<1x256xi1>, vector<1x256xf32>
    %c4_i32_151 = arith.constant 4 : i32
    %679 = vector.broadcast %c4_i32_151 : i32 to vector<1x256xi32>
    %680 = arith.cmpi eq, %11, %679 : vector<1x256xi32>
    %681 = arith.select %680, %57, %675 : vector<1x256xi1>, vector<1x256xf32>
    %c5_i32_152 = arith.constant 5 : i32
    %682 = vector.broadcast %c5_i32_152 : i32 to vector<1x256xi32>
    %683 = arith.cmpi eq, %10, %682 : vector<1x256xi32>
    %684 = arith.select %683, %58, %678 : vector<1x256xi1>, vector<1x256xf32>
    %c5_i32_153 = arith.constant 5 : i32
    %685 = vector.broadcast %c5_i32_153 : i32 to vector<1x256xi32>
    %686 = arith.cmpi eq, %11, %685 : vector<1x256xi32>
    %687 = arith.select %686, %58, %681 : vector<1x256xi1>, vector<1x256xf32>
    %c6_i32_154 = arith.constant 6 : i32
    %688 = vector.broadcast %c6_i32_154 : i32 to vector<1x256xi32>
    %689 = arith.cmpi eq, %10, %688 : vector<1x256xi32>
    %690 = arith.select %689, %59, %684 : vector<1x256xi1>, vector<1x256xf32>
    %c6_i32_155 = arith.constant 6 : i32
    %691 = vector.broadcast %c6_i32_155 : i32 to vector<1x256xi32>
    %692 = arith.cmpi eq, %11, %691 : vector<1x256xi32>
    %693 = arith.select %692, %59, %687 : vector<1x256xi1>, vector<1x256xf32>
    %c7_i32_156 = arith.constant 7 : i32
    %694 = vector.broadcast %c7_i32_156 : i32 to vector<1x256xi32>
    %695 = arith.cmpi eq, %10, %694 : vector<1x256xi32>
    %696 = arith.select %695, %60, %690 : vector<1x256xi1>, vector<1x256xf32>
    %c7_i32_157 = arith.constant 7 : i32
    %697 = vector.broadcast %c7_i32_157 : i32 to vector<1x256xi32>
    %698 = arith.cmpi eq, %11, %697 : vector<1x256xi32>
    %699 = arith.select %698, %60, %693 : vector<1x256xi1>, vector<1x256xf32>
    %c8_i32_158 = arith.constant 8 : i32
    %700 = vector.broadcast %c8_i32_158 : i32 to vector<1x256xi32>
    %701 = arith.cmpi eq, %10, %700 : vector<1x256xi32>
    %702 = arith.select %701, %61, %696 : vector<1x256xi1>, vector<1x256xf32>
    %c8_i32_159 = arith.constant 8 : i32
    %703 = vector.broadcast %c8_i32_159 : i32 to vector<1x256xi32>
    %704 = arith.cmpi eq, %11, %703 : vector<1x256xi32>
    %705 = arith.select %704, %61, %699 : vector<1x256xi1>, vector<1x256xf32>
    %c9_i32_160 = arith.constant 9 : i32
    %706 = vector.broadcast %c9_i32_160 : i32 to vector<1x256xi32>
    %707 = arith.cmpi eq, %10, %706 : vector<1x256xi32>
    %708 = arith.select %707, %62, %702 : vector<1x256xi1>, vector<1x256xf32>
    %c9_i32_161 = arith.constant 9 : i32
    %709 = vector.broadcast %c9_i32_161 : i32 to vector<1x256xi32>
    %710 = arith.cmpi eq, %11, %709 : vector<1x256xi32>
    %711 = arith.select %710, %62, %705 : vector<1x256xi1>, vector<1x256xf32>
    %cst_162 = arith.constant 1.000000e-01 : f32
    %712 = vector.broadcast %cst_162 : f32 to vector<1x256xf32>
    %713 = arith.cmpf olt, %708, %712 : vector<1x256xf32>
    %714 = arith.extui %713 : vector<1x256xi1> to vector<1x256xi32>
    %c1_i32_163 = arith.constant 1 : i32
    %715 = vector.broadcast %c1_i32_163 : i32 to vector<1x256xi32>
    %716 = arith.subi %715, %714 : vector<1x256xi32>
    %717 = arith.muli %714, %112 : vector<1x256xi32>
    %718 = arith.muli %716, %10 : vector<1x256xi32>
    %719 = arith.addi %717, %718 : vector<1x256xi32>
    %720 = arith.divf %81, %200 : vector<1x256xf32>
    %721 = arith.divf %200, %649 : vector<1x256xf32>
    %722 = arith.cmpf ogt, %720, %721 : vector<1x256xf32>
    %723 = arith.cmpf olt, %708, %288 : vector<1x256xf32>
    %724 = arith.andi %722, %723 : vector<1x256xi1>
    %725 = arith.extui %724 : vector<1x256xi1> to vector<1x256xi32>
    %726 = arith.cmpi eq, %112, %10 : vector<1x256xi32>
    %727 = arith.extui %726 : vector<1x256xi1> to vector<1x256xi32>
    %728 = arith.cmpi eq, %112, %11 : vector<1x256xi32>
    %729 = arith.extui %728 : vector<1x256xi1> to vector<1x256xi32>
    %730 = arith.muli %714, %725 : vector<1x256xi32>
    %731 = arith.muli %716, %727 : vector<1x256xi32>
    %732 = arith.addi %730, %731 : vector<1x256xi32>
    %733 = arith.muli %729, %732 : vector<1x256xi32>
    %734 = arith.cmpf ole, %711, %640 : vector<1x256xf32>
    %735 = arith.extui %734 : vector<1x256xi1> to vector<1x256xi32>
    %cst_164 = arith.constant 0.000000e+00 : f32
    %736 = vector.broadcast %cst_164 : f32 to vector<1x256xf32>
    %c0_i32_165 = arith.constant 0 : i32
    %737 = vector.broadcast %c0_i32_165 : i32 to vector<1x256xi32>
    %738 = arith.cmpi eq, %719, %737 : vector<1x256xi32>
    %cst_166 = arith.constant 0.000000e+00 : f32
    %739 = vector.broadcast %cst_166 : f32 to vector<1x256xf32>
    %740 = arith.subf %739, %63 : vector<1x256xf32>
    %741 = arith.select %738, %740, %736 : vector<1x256xi1>, vector<1x256xf32>
    %c1_i32_167 = arith.constant 1 : i32
    %742 = vector.broadcast %c1_i32_167 : i32 to vector<1x256xi32>
    %743 = arith.cmpi eq, %719, %742 : vector<1x256xi32>
    %cst_168 = arith.constant 0.000000e+00 : f32
    %744 = vector.broadcast %cst_168 : f32 to vector<1x256xf32>
    %745 = arith.subf %744, %64 : vector<1x256xf32>
    %746 = arith.select %743, %745, %741 : vector<1x256xi1>, vector<1x256xf32>
    %c2_i32_169 = arith.constant 2 : i32
    %747 = vector.broadcast %c2_i32_169 : i32 to vector<1x256xi32>
    %748 = arith.cmpi eq, %719, %747 : vector<1x256xi32>
    %cst_170 = arith.constant 0.000000e+00 : f32
    %749 = vector.broadcast %cst_170 : f32 to vector<1x256xf32>
    %750 = arith.subf %749, %65 : vector<1x256xf32>
    %751 = arith.select %748, %750, %746 : vector<1x256xi1>, vector<1x256xf32>
    %c3_i32_171 = arith.constant 3 : i32
    %752 = vector.broadcast %c3_i32_171 : i32 to vector<1x256xi32>
    %753 = arith.cmpi eq, %719, %752 : vector<1x256xi32>
    %cst_172 = arith.constant 0.000000e+00 : f32
    %754 = vector.broadcast %cst_172 : f32 to vector<1x256xf32>
    %755 = arith.subf %754, %66 : vector<1x256xf32>
    %756 = arith.select %753, %755, %751 : vector<1x256xi1>, vector<1x256xf32>
    %c4_i32_173 = arith.constant 4 : i32
    %757 = vector.broadcast %c4_i32_173 : i32 to vector<1x256xi32>
    %758 = arith.cmpi eq, %719, %757 : vector<1x256xi32>
    %cst_174 = arith.constant 0.000000e+00 : f32
    %759 = vector.broadcast %cst_174 : f32 to vector<1x256xf32>
    %760 = arith.subf %759, %67 : vector<1x256xf32>
    %761 = arith.select %758, %760, %756 : vector<1x256xi1>, vector<1x256xf32>
    %c5_i32_175 = arith.constant 5 : i32
    %762 = vector.broadcast %c5_i32_175 : i32 to vector<1x256xi32>
    %763 = arith.cmpi eq, %719, %762 : vector<1x256xi32>
    %cst_176 = arith.constant 0.000000e+00 : f32
    %764 = vector.broadcast %cst_176 : f32 to vector<1x256xf32>
    %765 = arith.subf %764, %68 : vector<1x256xf32>
    %766 = arith.select %763, %765, %761 : vector<1x256xi1>, vector<1x256xf32>
    %c6_i32_177 = arith.constant 6 : i32
    %767 = vector.broadcast %c6_i32_177 : i32 to vector<1x256xi32>
    %768 = arith.cmpi eq, %719, %767 : vector<1x256xi32>
    %cst_178 = arith.constant 0.000000e+00 : f32
    %769 = vector.broadcast %cst_178 : f32 to vector<1x256xf32>
    %770 = arith.subf %769, %69 : vector<1x256xf32>
    %771 = arith.select %768, %770, %766 : vector<1x256xi1>, vector<1x256xf32>
    %c7_i32_179 = arith.constant 7 : i32
    %772 = vector.broadcast %c7_i32_179 : i32 to vector<1x256xi32>
    %773 = arith.cmpi eq, %719, %772 : vector<1x256xi32>
    %cst_180 = arith.constant 0.000000e+00 : f32
    %774 = vector.broadcast %cst_180 : f32 to vector<1x256xf32>
    %775 = arith.subf %774, %70 : vector<1x256xf32>
    %776 = arith.select %773, %775, %771 : vector<1x256xi1>, vector<1x256xf32>
    %c8_i32_181 = arith.constant 8 : i32
    %777 = vector.broadcast %c8_i32_181 : i32 to vector<1x256xi32>
    %778 = arith.cmpi eq, %719, %777 : vector<1x256xi32>
    %cst_182 = arith.constant 0.000000e+00 : f32
    %779 = vector.broadcast %cst_182 : f32 to vector<1x256xf32>
    %780 = arith.subf %779, %71 : vector<1x256xf32>
    %781 = arith.select %778, %780, %776 : vector<1x256xi1>, vector<1x256xf32>
    %c9_i32_183 = arith.constant 9 : i32
    %782 = vector.broadcast %c9_i32_183 : i32 to vector<1x256xi32>
    %783 = arith.cmpi eq, %719, %782 : vector<1x256xi32>
    %cst_184 = arith.constant 0.000000e+00 : f32
    %784 = vector.broadcast %cst_184 : f32 to vector<1x256xf32>
    %785 = arith.subf %784, %72 : vector<1x256xf32>
    %786 = arith.select %783, %785, %781 : vector<1x256xi1>, vector<1x256xf32>
    %cst_185 = arith.constant 1.000000e+00 : f32
    %787 = vector.broadcast %cst_185 : f32 to vector<1x256xf32>
    %788 = arith.cmpf olt, %81, %787 : vector<1x256xf32>
    %789 = arith.extui %788 : vector<1x256xi1> to vector<1x256xi32>
    %790 = arith.muli %714, %789 : vector<1x256xi32>
    %c1_i32_186 = arith.constant 1 : i32
    %791 = vector.broadcast %c1_i32_186 : i32 to vector<1x256xi32>
    %792 = arith.subi %791, %790 : vector<1x256xi32>
    %793 = arith.sitofp %792 : vector<1x256xi32> to vector<1x256xf32>
    %794 = arith.mulf %786, %793 : vector<1x256xf32>
    %cst_187 = arith.constant 0.000000e+00 : f32
    %795 = vector.broadcast %cst_187 : f32 to vector<1x256xf32>
    %c0_188 = arith.constant 0 : index
    %c0_189 = arith.constant 0 : index
    %796 = vector.load %arg3[%c0_188, %c0_189] : memref<8x256xf32, #tpu.memory_space<vmem>>, vector<1x256xf32>
    tpu.vector_store %arg3[%c0_188, %c0_189], %81 {strides = array<i32>} : memref<8x256xf32, #tpu.memory_space<vmem>>, vector<1x256xf32>,
    %c1_190 = arith.constant 1 : index
    %c0_191 = arith.constant 0 : index
    %797 = vector.load %arg3[%c1_190, %c0_191] : memref<8x256xf32, #tpu.memory_space<vmem>>, vector<1x256xf32>
    tpu.vector_store %arg3[%c1_190, %c0_191], %200 {strides = array<i32>} : memref<8x256xf32, #tpu.memory_space<vmem>>, vector<1x256xf32>,
    %c2_192 = arith.constant 2 : index
    %c0_193 = arith.constant 0 : index
    %798 = vector.load %arg3[%c2_192, %c0_193] : memref<8x256xf32, #tpu.memory_space<vmem>>, vector<1x256xf32>
    tpu.vector_store %arg3[%c2_192, %c0_193], %288 {strides = array<i32>} : memref<8x256xf32, #tpu.memory_space<vmem>>, vector<1x256xf32>,
    %c3_194 = arith.constant 3 : index
    %c0_195 = arith.constant 0 : index
    %799 = vector.load %arg3[%c3_194, %c0_195] : memref<8x256xf32, #tpu.memory_space<vmem>>, vector<1x256xf32>
    tpu.vector_store %arg3[%c3_194, %c0_195], %376 {strides = array<i32>} : memref<8x256xf32, #tpu.memory_space<vmem>>, vector<1x256xf32>,
    %c4_196 = arith.constant 4 : index
    %c0_197 = arith.constant 0 : index
    %800 = vector.load %arg3[%c4_196, %c0_197] : memref<8x256xf32, #tpu.memory_space<vmem>>, vector<1x256xf32>
    tpu.vector_store %arg3[%c4_196, %c0_197], %464 {strides = array<i32>} : memref<8x256xf32, #tpu.memory_space<vmem>>, vector<1x256xf32>,
    %c5_198 = arith.constant 5 : index
    %c0_199 = arith.constant 0 : index
    %801 = vector.load %arg3[%c5_198, %c0_199] : memref<8x256xf32, #tpu.memory_space<vmem>>, vector<1x256xf32>
    tpu.vector_store %arg3[%c5_198, %c0_199], %794 {strides = array<i32>} : memref<8x256xf32, #tpu.memory_space<vmem>>, vector<1x256xf32>,
    %c6_200 = arith.constant 6 : index
    %c0_201 = arith.constant 0 : index
    %802 = vector.load %arg3[%c6_200, %c0_201] : memref<8x256xf32, #tpu.memory_space<vmem>>, vector<1x256xf32>
    tpu.vector_store %arg3[%c6_200, %c0_201], %795 {strides = array<i32>} : memref<8x256xf32, #tpu.memory_space<vmem>>, vector<1x256xf32>,
    %c7_202 = arith.constant 7 : index
    %c0_203 = arith.constant 0 : index
    %803 = vector.load %arg3[%c7_202, %c0_203] : memref<8x256xf32, #tpu.memory_space<vmem>>, vector<1x256xf32>
    tpu.vector_store %arg3[%c7_202, %c0_203], %795 {strides = array<i32>} : memref<8x256xf32, #tpu.memory_space<vmem>>, vector<1x256xf32>,
    %c0_i32_204 = arith.constant 0 : i32
    %804 = vector.broadcast %c0_i32_204 : i32 to vector<1x256xi32>
    %c0_205 = arith.constant 0 : index
    %c0_206 = arith.constant 0 : index
    %805 = vector.load %arg4[%c0_205, %c0_206] : memref<8x256xi32, #tpu.memory_space<vmem>>, vector<1x256xi32>
    tpu.vector_store %arg4[%c0_205, %c0_206], %112 {strides = array<i32>} : memref<8x256xi32, #tpu.memory_space<vmem>>, vector<1x256xi32>,
    %c1_207 = arith.constant 1 : index
    %c0_208 = arith.constant 0 : index
    %806 = vector.load %arg4[%c1_207, %c0_208] : memref<8x256xi32, #tpu.memory_space<vmem>>, vector<1x256xi32>
    tpu.vector_store %arg4[%c1_207, %c0_208], %719 {strides = array<i32>} : memref<8x256xi32, #tpu.memory_space<vmem>>, vector<1x256xi32>,
    %c2_209 = arith.constant 2 : index
    %c0_210 = arith.constant 0 : index
    %807 = vector.load %arg4[%c2_209, %c0_210] : memref<8x256xi32, #tpu.memory_space<vmem>>, vector<1x256xi32>
    tpu.vector_store %arg4[%c2_209, %c0_210], %714 {strides = array<i32>} : memref<8x256xi32, #tpu.memory_space<vmem>>, vector<1x256xi32>,
    %c3_211 = arith.constant 3 : index
    %c0_212 = arith.constant 0 : index
    %808 = vector.load %arg4[%c3_211, %c0_212] : memref<8x256xi32, #tpu.memory_space<vmem>>, vector<1x256xi32>
    tpu.vector_store %arg4[%c3_211, %c0_212], %735 {strides = array<i32>} : memref<8x256xi32, #tpu.memory_space<vmem>>, vector<1x256xi32>,
    %c4_213 = arith.constant 4 : index
    %c0_214 = arith.constant 0 : index
    %809 = vector.load %arg4[%c4_213, %c0_214] : memref<8x256xi32, #tpu.memory_space<vmem>>, vector<1x256xi32>
    tpu.vector_store %arg4[%c4_213, %c0_214], %732 {strides = array<i32>} : memref<8x256xi32, #tpu.memory_space<vmem>>, vector<1x256xi32>,
    %c5_215 = arith.constant 5 : index
    %c0_216 = arith.constant 0 : index
    %810 = vector.load %arg4[%c5_215, %c0_216] : memref<8x256xi32, #tpu.memory_space<vmem>>, vector<1x256xi32>
    tpu.vector_store %arg4[%c5_215, %c0_216], %733 {strides = array<i32>} : memref<8x256xi32, #tpu.memory_space<vmem>>, vector<1x256xi32>,
    %c6_217 = arith.constant 6 : index
    %c0_218 = arith.constant 0 : index
    %811 = vector.load %arg4[%c6_217, %c0_218] : memref<8x256xi32, #tpu.memory_space<vmem>>, vector<1x256xi32>
    tpu.vector_store %arg4[%c6_217, %c0_218], %804 {strides = array<i32>} : memref<8x256xi32, #tpu.memory_space<vmem>>, vector<1x256xi32>,
    %c7_219 = arith.constant 7 : index
    %c0_220 = arith.constant 0 : index
    %812 = vector.load %arg4[%c7_219, %c0_220] : memref<8x256xi32, #tpu.memory_space<vmem>>, vector<1x256xi32>
    tpu.vector_store %arg4[%c7_219, %c0_220], %804 {strides = array<i32>} : memref<8x256xi32, #tpu.memory_space<vmem>>, vector<1x256xi32>,
    return
  }
  func.func @transform_0(%arg0: i32) -> (i32, i32) {
    %c0_i32 = arith.constant 0 : i32
    %c0_i32_0 = arith.constant 0 : i32
    return %c0_i32, %arg0 : i32, i32
  }
  func.func @transform_1(%arg0: i32) -> (i32, i32) {
    %c0_i32 = arith.constant 0 : i32
    %c0_i32_0 = arith.constant 0 : i32
    return %c0_i32, %arg0 : i32, i32
  }
  func.func @transform_2(%arg0: i32) -> (i32, i32) {
    %c0_i32 = arith.constant 0 : i32
    %c0_i32_0 = arith.constant 0 : i32
    return %c0_i32, %arg0 : i32, i32
  }
  func.func @transform_3(%arg0: i32) -> (i32, i32) {
    %c0_i32 = arith.constant 0 : i32
    %c0_i32_0 = arith.constant 0 : i32
    return %c0_i32, %arg0 : i32, i32
  }
}

</mosaic_0001>

<bundles_post_ra>
// kernel: tpu_custom_call.1
= control target key start
LH: loop header
LB: loop body
LE: loop exit
PB: predicated region body
PF: predicated region fallthrough
CT: control target
= control target key end

     0   :  { %9 = vsyncpa [#allocation3], 0  ;;  %s1613_s0 = inlined_call_operand.hbm [shape: f32[10,256], index: 0, kind: input, shape index: {}]   ;;  %s1614_s1 = inlined_call_operand.hbm [shape: s32[2,256], index: 1, kind: input, shape index: {}]   ;;  %s1615_s2 = inlined_call_operand.hbm [shape: f32[8,256], index: 2, kind: output, shape index: {0}]   ;;  %s1616_s3 = inlined_call_operand.hbm [shape: s32[8,256], index: 3, kind: output, shape index: {1}]  }
   0x1   :  { %10 = vsyncpa [#allocation6], 0 }
   0x2   :  { %11 = vsyncpa [#allocation4], 0 }
   0x3   :  { %12 = vsyncpa [#allocation9], 0  ;;  %s858_s12 = smov [#allocation2]  }
   0x4   :  { %s18_s13 = sshll.u32 %s858_s12, 4  ;;  %s19_s13 = int_to_ptr.vmem [resolvable:$true] %s18_s13 }
   0x5   :  { %s778_s14 = scalar_lea.vmem %s19_s13, 512  ;;  %p783_p1 = scmp.lt.s32.totalorder %s19_s13, %s19_s13 }
   0x6   :  { %p779_p0 = scmp.ne.s32.totalorder %s19_s13, %s778_s14  ;;  %p784_p2 = scmp.lt.s32.totalorder %s778_s14, %s778_s14 }
   0x8   :  { %p785_p3 = por %p784_p2, %p783_p1 }
   0xa   :  { %p786_p4 = pnand %p785_p3, %p779_p0 }
   0xc   :  { %789 = shalt.err (!%p786_p4)
}
   0xd   :  { %s859_s15 = smov 256   ;;  %s860_s16 = smov 16  }
   0xe   :  { %24 = dma.hbm_to_vmem [thread:$0]  %s1613_s0, 512, %s19_s13, [#allocation3], %s859_s15, %s859_s15, %s860_s16  }
   0xf   :  { %s861_s19 = smov [#allocation5]  }
  0x10   :  { %s31_s20 = sshll.u32 %s861_s19, 4  ;;  %s32_s20 = int_to_ptr.vmem [resolvable:$true] %s31_s20 }
  0x11   :  { %s798_s21 = scalar_lea.vmem %s32_s20, 64  ;;  %p803_p6 = scmp.lt.s32.totalorder %s32_s20, %s32_s20 }
  0x12   :  { %p799_p5 = scmp.ne.s32.totalorder %s32_s20, %s798_s21  ;;  %p804_p7 = scmp.lt.s32.totalorder %s798_s21, %s798_s21 }
  0x14   :  { %p805_p8 = por %p804_p7, %p803_p6 }
  0x16   :  { %p806_p9 = pnand %p805_p8, %p799_p5 }
  0x18   :  { %809 = shalt.err (!%p806_p9)
}
  0x19   :  { %34 = dma.hbm_to_vmem [thread:$0]  %s1614_s1, 64, %s32_s20, [#allocation6]  }
  0x1a   :  { %850 = dma.done.wait [#allocation3], 512  }
  0x1b   :  { %851 = vsyncadd [#allocation3], 4294966784 }
  0x1c   :  { %852 = dma.done.wait [#allocation6], 64  }
  0x1d   :  { %853 = vsyncadd [#allocation6], 4294967232  ;;  %v647_v0 = vlaneseq  ;;  %v862_v2 = vmov 0   ;;  %v41_v3 = vld [vmem:[#allocation2] ss:$8 sm:$0x3] }
  0x1e   :  { %v43_v4 = vld [vmem:[#allocation2 + $0x1] ss:$8 sm:$0x3]  ;;  %v45_v5 = vld [vmem:[#allocation2 + $0x2] ss:$8 sm:$0x3] }
  0x1f   :  { %vm893_vm0 = vcmp.lt.s32.totalorder %v647_v0, 256  ;;  %v63_v6 = vmax.f32 %v41_v3, %v43_v4  ;;  %v47_v7 = vld [vmem:[#allocation2 + $0x3] ss:$8 sm:$0x3]  ;;  %s865_s0 = smov [#allocation7]  }
  0x20   :  { %692 = vst.msk [vmem:[#allocation8 + $0x6] ss:$8 sm:$0x3] %vm893_vm0, %v862_v2  ;;  %695 = vst.msk [vmem:[#allocation8 + $0x7] ss:$8 sm:$0x3] %vm893_vm0, %v862_v2 }
  0x21   :  { %v64_v8 = vmax.f32 %v63_v6, %v45_v5  ;;  %v49_v9 = vld [vmem:[#allocation2 + $0x4] ss:$8 sm:$0x3]  ;;  %v51_v11 = vld [vmem:[#allocation2 + $0x5] ss:$8 sm:$0x3] }
  0x22   :  { %v53_v13 = vld [vmem:[#allocation2 + $0x6] ss:$8 sm:$0x3]  ;;  %v55_v15 = vld [vmem:[#allocation2 + $0x7] ss:$8 sm:$0x3] }
  0x23   :  { %v65_v10 = vmax.f32 %v64_v8, %v47_v7  ;;  %v57_v17 = vld [vmem:[#allocation2 + $0x10] ss:$8 sm:$0x3]  ;;  %v59_v19 = vld [vmem:[#allocation2 + $0x11] ss:$8 sm:$0x3] }
  0x24   :  { %s703_s1 = sshll.u32 %s865_s0, 4  ;;  %s704_s1 = int_to_ptr.vmem [resolvable:$true] %s703_s1 }
  0x25   :  { %v66_v12 = vmax.f32 %v65_v10, %v49_v9  ;;  %s810_s24 = scalar_lea.vmem %s704_s1, 256  ;;  %p815_p11 = scmp.lt.s32.totalorder %s704_s1, %s704_s1 }
  0x26   :  { %p811_p10 = scmp.ne.s32.totalorder %s704_s1, %s810_s24  ;;  %p816_p12 = scmp.lt.s32.totalorder %s810_s24, %s810_s24 }
  0x27   :  { %v67_v14 = vmax.f32 %v66_v12, %v51_v11 }
  0x28   :  { %p817_p13 = por %p816_p12, %p815_p11 }
  0x29   :  { %v68_v16 = vmax.f32 %v67_v14, %v53_v13 }
  0x2a   :  { %p818_p0 = pnand %p817_p13, %p811_p10 }
  0x2b   :  { %v69_v18 = vmax.f32 %v68_v16, %v55_v15 }
  0x2d   :  { %v70_v20 = vmax.f32 %v69_v18, %v57_v17 }
  0x2f   :  { %v71_v21 = vmax.f32 %v70_v20, %v59_v19 }
  0x31   :  { %v903_v22 = vsub.f32 %v41_v3, %v71_v21  ;;  %v905_v23 = vsub.f32 %v43_v4, %v71_v21  ;;  %v907_v24 = vsub.f32 %v45_v5, %v71_v21  ;;  %v909_v25 = vsub.f32 %v47_v7, %v71_v21 }
  0x32   :  { %v911_v26 = vsub.f32 %v49_v9, %v71_v21  ;;  %v915_v29 = vsub.f32 %v51_v11, %v71_v21  ;;  %v919_v32 = vsub.f32 %v53_v13, %v71_v21  ;;  %v922_v34 = vsub.f32 %v55_v15, %v71_v21 }
  0x33   :  { %v82_v27 = vmul.f32 1.442695, %v903_v22  ;;  %v84_v28 = vmul.f32 1.442695, %v905_v23  ;;  %v86_v30 = vmul.f32 1.442695, %v907_v24  ;;  %v925_v36 = vsub.f32 %v57_v17, %v71_v21 }
  0x34   :  { %v88_v31 = vmul.f32 1.442695, %v909_v25  ;;  %v90_v33 = vmul.f32 1.442695, %v911_v26  ;;  %v92_v35 = vmul.f32 1.442695, %v915_v29  ;;  %v928_v38 = vsub.f32 %v59_v19, %v71_v21 }
  0x35   :  { %742 = vpow2.f32 %v82_v27  ;;  %v94_v37 = vmul.f32 1.442695, %v919_v32  ;;  %v96_v39 = vmul.f32 1.442695, %v922_v34  ;;  %v98_v40 = vmul.f32 1.442695, %v925_v36 }
  0x36   :  { %744 = vpow2.f32 %v84_v28  ;;  %v100_v41 = vmul.f32 1.442695, %v928_v38 }
  0x37   :  { %746 = vpow2.f32 %v86_v30 }
  0x38   :  { %748 = vpow2.f32 %v88_v31 }
  0x39   :  { %750 = vpow2.f32 %v90_v33 }
  0x3a   :  { %752 = vpow2.f32 %v92_v35 }
  0x3b   :  { %754 = vpow2.f32 %v94_v37 }
  0x3c   :  { %756 = vpow2.f32 %v96_v39 }
  0x3d   :  { %758 = vpow2.f32 %v98_v40 }
  0x3e   :  { %760 = vpow2.f32 %v100_v41 }
  0x42   :  { %v743_v42 = vpop.eup %742 }
  0x43   :  { %v745_v43 = vpop.eup %744 }
  0x44   :  { %v747_v44 = vpop.eup %746  ;;  %v102_v45 = vadd.f32 %v745_v43, %v743_v42 }
  0x45   :  { %v749_v46 = vpop.eup %748 }
  0x46   :  { %v103_v47 = vadd.f32 %v747_v44, %v102_v45  ;;  %v751_v48 = vpop.eup %750 }
  0x47   :  { %v753_v50 = vpop.eup %752 }
  0x48   :  { %v104_v49 = vadd.f32 %v749_v46, %v103_v47  ;;  %v755_v52 = vpop.eup %754 }
  0x49   :  { %v757_v54 = vpop.eup %756 }
  0x4a   :  { %v105_v51 = vadd.f32 %v751_v48, %v104_v49  ;;  %v759_v56 = vpop.eup %758 }
  0x4b   :  { %v761_v58 = vpop.eup %760 }
  0x4c   :  { %v106_v53 = vadd.f32 %v753_v50, %v105_v51 }
  0x4e   :  { %v107_v55 = vadd.f32 %v755_v52, %v106_v53 }
  0x50   :  { %v108_v57 = vadd.f32 %v757_v54, %v107_v55 }
  0x52   :  { %v109_v59 = vadd.f32 %v759_v56, %v108_v57 }
  0x54   :  { %v933_v60 = vadd.f32 %v761_v58, %v109_v59 }
  0x56   :  { %762 = vrcp.f32 %v933_v60 }
  0x57   :  { %764 = vlog2.f32 %v933_v60 }
  0x63   :  { %v763_v61 = vpop.eup %762 }
  0x64   :  { %v936_v62 = vmul.f32 %v763_v61, %v743_v42  ;;  %v938_v63 = vmul.f32 %v763_v61, %v745_v43  ;;  %v940_v0 = vmul.f32 %v763_v61, %v747_v44  ;;  %v942_v3 = vmul.f32 %v763_v61, %v749_v46 }
  0x65   :  { %v946_v5 = vmul.f32 %v763_v61, %v751_v48  ;;  %v949_v7 = vmul.f32 %v763_v61, %v753_v50  ;;  %v952_v9 = vmul.f32 %v763_v61, %v755_v52  ;;  %v955_v11 = vmul.f32 %v763_v61, %v757_v54 }
  0x66   :  { %v135_v4 = vmax.f32 %v936_v62, %v938_v63  ;;  %v958_v13 = vmul.f32 %v763_v61, %v759_v56  ;;  %v961_v15 = vmul.f32 %v763_v61, %v761_v58 }
  0x68   :  { %v136_v6 = vmax.f32 %v135_v4, %v940_v0 }
  0x6a   :  { %v137_v8 = vmax.f32 %v136_v6, %v942_v3 }
  0x6c   :  { %v138_v10 = vmax.f32 %v137_v8, %v946_v5 }
  0x6e   :  { %v139_v12 = vmax.f32 %v138_v10, %v949_v7 }
  0x70   :  { %v140_v14 = vmax.f32 %v139_v12, %v952_v9 }
  0x72   :  { %v141_v16 = vmax.f32 %v140_v14, %v955_v11 }
  0x74   :  { %v142_v17 = vmax.f32 %v141_v16, %v958_v13 }
  0x76   :  { %v966_v18 = vmax.f32 %v142_v17, %v961_v15 }
  0x78   :  { %651 = vst.msk [vmem:[#allocation7] ss:$8 sm:$0x3] %vm893_vm0, %v966_v18  ;;  %vm1618_vm1 = vcmp.eq.f32.partialorder %v938_v63, %v966_v18  ;;  %vm1617_vm2 = vcmp.eq.f32.partialorder %v936_v62, %v966_v18  ;;  %vm1619_vm5 = vcmp.eq.f32.partialorder %v940_v0, %v966_v18  ;;  %vm156_vm8 = vcmp.eq.f32.partialorder %v942_v3, %v966_v18 }
  0x79   :  { %v165_v19 = vsel %vm1617_vm2, 1, %v862_v2  ;;  %vm727_vm3 = vmneg %vm1617_vm2  ;;  %v164_v28 = vsel %vm1617_vm2, -1e+30, %v936_v62  ;;  %vm154_vm11 = vcmp.eq.f32.partialorder %v946_v5, %v966_v18  ;;  %vm152_vm14 = vcmp.eq.f32.partialorder %v949_v7, %v966_v18 }
  0x7a   :  { %vm167_vm4 = vmand %vm1618_vm1, %vm727_vm3 }
  0x7b   :  { %v169_v20 = vsel %vm167_vm4, 1, %v862_v2  ;;  %v168_v30 = vsel %vm167_vm4, -1e+30, %v938_v63  ;;  %vm150_vm4 = vcmp.eq.f32.partialorder %v952_v9, %v966_v18 }
  0x7c   :  { %v170_v21 = vadd.s32 %v169_v20, %v165_v19  ;;  %v209_v33 = vmax.f32 %v164_v28, %v168_v30 }
  0x7e   :  { %vm171_vm6 = vcmp.eq.s32.totalorder %v170_v21, 0 }
  0x7f   :  { %vm172_vm7 = vmand %vm1619_vm5, %vm171_vm6 }
  0x80   :  { %v174_v27 = vsel %vm172_vm7, 1, %v862_v2  ;;  %v173_v35 = vsel %vm172_vm7, -1e+30, %v940_v0 }
  0x81   :  { %v175_v31 = vadd.s32 %v174_v27, %v170_v21  ;;  %v210_v40 = vmax.f32 %v209_v33, %v173_v35 }
  0x83   :  { %vm176_vm9 = vcmp.eq.s32.totalorder %v175_v31, 0 }
  0x84   :  { %vm177_vm10 = vmand %vm156_vm8, %vm176_vm9  ;;  %vm148_vm9 = vcmp.eq.f32.partialorder %v955_v11, %v966_v18 }
  0x85   :  { %v179_v37 = vsel %vm177_vm10, 1, %v862_v2  ;;  %v1007_v41 = vsel %vm177_vm10, -1e+30, %v942_v3 }
  0x86   :  { %v180_v39 = vadd.s32 %v179_v37, %v175_v31  ;;  %v211_v44 = vmax.f32 %v210_v40, %v1007_v41 }
  0x88   :  { %vm181_vm12 = vcmp.eq.s32.totalorder %v180_v39, 0 }
  0x89   :  { %vm182_vm13 = vmand %vm154_vm11, %vm181_vm12 }
  0x8a   :  { %v184_v42 = vsel %vm182_vm13, 1, %v862_v2  ;;  %v1017_v45 = vsel %vm182_vm13, -1e+30, %v946_v5  ;;  %vm146_vm13 = vcmp.eq.f32.partialorder %v958_v13, %v966_v18 }
  0x8b   :  { %v185_v43 = vadd.s32 %v184_v42, %v180_v39  ;;  %v212_v48 = vmax.f32 %v211_v44, %v1017_v45 }
  0x8d   :  { %vm186_vm15 = vcmp.eq.s32.totalorder %v185_v43, 0 }
  0x8e   :  { %vm187_vm3 = vmand %vm152_vm14, %vm186_vm15 }
  0x8f   :  { %v189_v46 = vsel %vm187_vm3, 1, %v862_v2  ;;  %v1027_v49 = vsel %vm187_vm3, -1e+30, %v949_v7 }
  0x90   :  { %v190_v47 = vadd.s32 %v189_v46, %v185_v43  ;;  %v213_v51 = vmax.f32 %v212_v48, %v1027_v49 }
  0x92   :  { %vm191_vm6 = vcmp.eq.s32.totalorder %v190_v47, 0 }
  0x93   :  { %vm192_vm7 = vmand %vm150_vm4, %vm191_vm6  ;;  %vm144_vm6 = vcmp.eq.f32.partialorder %v961_v15, %v966_v18 }
  0x94   :  { %v194_v50 = vsel %vm192_vm7, 1, %v862_v2  ;;  %v1037_v52 = vsel %vm192_vm7, -1e+30, %v952_v9 }
  0x95   :  { %v195_v53 = vadd.s32 %v194_v50, %v190_v47  ;;  %v214_v54 = vmax.f32 %v213_v51, %v1037_v52 }
  0x97   :  { %vm196_vm10 = vcmp.eq.s32.totalorder %v195_v53, 0 }
  0x98   :  { %vm197_vm12 = vmand %vm148_vm9, %vm196_vm10 }
  0x99   :  { %v1044_v55 = vsel %vm197_vm12, -1e+30, %v955_v11  ;;  %v199_v56 = vsel %vm197_vm12, 1, %v862_v2 }
  0x9a   :  { %v200_v57 = vadd.s32 %v199_v56, %v195_v53  ;;  %v215_v58 = vmax.f32 %v214_v54, %v1044_v55 }
  0x9c   :  { %vm201_vm15 = vcmp.eq.s32.totalorder %v200_v57, 0 }
  0x9d   :  { %vm202_vm3 = vmand %vm146_vm13, %vm201_vm15 }
  0x9e   :  { %v1054_v59 = vsel %vm202_vm3, -1e+30, %v958_v13  ;;  %v204_v61 = vsel %vm202_vm3, 1, %v862_v2 }
  0x9f   :  { %v205_v4 = vadd.s32 %v204_v61, %v200_v57  ;;  %v216_v6 = vmax.f32 %v215_v58, %v1054_v59 }
  0xa1   :  { %vm206_vm7 = vcmp.eq.s32.totalorder %v205_v4, 0 }
  0xa2   :  { %vm207_vm10 = vmand %vm144_vm6, %vm206_vm7 }
  0xa3   :  { %v1064_v8 = vsel %vm207_vm10, -1e+30, %v961_v15 }
  0xa4   :  { %v1067_v10 = vmax.f32 %v216_v6, %v1064_v8 }
  0xa6   :  { %654 = vst.msk [vmem:[#allocation7 + $0x1] ss:$8 sm:$0x3] %vm893_vm0, %v1067_v10  ;;  %vm218_vm12 = vcmp.eq.f32.partialorder %v164_v28, %v1067_v10  ;;  %vm221_vm15 = vcmp.eq.f32.partialorder %v168_v30, %v1067_v10  ;;  %vm227_vm7 = vcmp.eq.f32.partialorder %v173_v35, %v1067_v10  ;;  %vm233_vm5 = vcmp.eq.f32.partialorder %v1007_v41, %v1067_v10 }
  0xa7   :  { %v220_v12 = vsel %vm218_vm12, 1, %v862_v2  ;;  %vm728_vm3 = vmneg %vm218_vm12  ;;  %v1077_v17 = vsel %vm218_vm12, -1e+30, %v164_v28  ;;  %v1090_v28 = vld [vmem:[#allocation5] ss:$2 sm:$0x3]  ;;  %vm245_vm12 = vcmp.eq.f32.partialorder %v1027_v49, %v1067_v10  ;;  %766 = vrcp.f32 %v1067_v10 }
  0xa8   :  { %vm223_vm2 = vmand %vm221_vm15, %vm728_vm3  ;;  %vm239_vm15 = vcmp.eq.f32.partialorder %v1017_v45, %v1067_v10  ;;  %vm551_vm3 = vcmp.eq.s32.totalorder %v1090_v28, 1 }
  0xa9   :  { %v225_v14 = vsel %vm223_vm2, 1, %v862_v2  ;;  %v1079_v19 = vsel %vm223_vm2, -1e+30, %v168_v30  ;;  %v863_v30 = vmov 10  }
  0xaa   :  { %v226_v16 = vadd.s32 %v225_v14, %v220_v12  ;;  %v273_v31 = vmax.f32 %v1077_v17, %v1079_v19  ;;  %v145_v33 = vsel %vm144_vm6, 9, %v863_v30  ;;  %vm555_vm6 = vcmp.eq.s32.totalorder %v1090_v28, 2  ;;  %v765_v30 = vpop.eup %764 }
  0xab   :  { %v147_v60 = vsel %vm146_vm13, 8, %v145_v33 }
  0xac   :  { %vm228_vm10 = vcmp.eq.s32.totalorder %v226_v16, 0  ;;  %v149_v42 = vsel %vm148_vm9, 7, %v147_v60  ;;  %vm567_vm9 = vcmp.eq.s32.totalorder %v1090_v28, 5 }
  0xad   :  { %vm229_vm1 = vmand %vm227_vm7, %vm228_vm10  ;;  %vm559_vm10 = vcmp.eq.s32.totalorder %v1090_v28, 3  ;;  %v151_v47 = vsel %vm150_vm4, 6, %v149_v42  ;;  %vm571_vm4 = vcmp.eq.s32.totalorder %v1090_v28, 6 }
  0xae   :  { %v231_v20 = vsel %vm229_vm1, 1, %v862_v2  ;;  %v1082_v21 = vsel %vm229_vm1, -1e+30, %v173_v35  ;;  %vm547_vm1 = vcmp.eq.s32.totalorder %v1090_v28, 0  ;;  %v864_v35 = vmov 0.0  }
  0xaf   :  { %v232_v27 = vadd.s32 %v231_v20, %v226_v16  ;;  %669 = vst.msk [vmem:[#allocation7 + $0x6] ss:$8 sm:$0x3] %vm893_vm0, %v864_v35  ;;  %672 = vst.msk [vmem:[#allocation7 + $0x7] ss:$8 sm:$0x3] %vm893_vm0, %v864_v35  ;;  %v274_v40 = vmax.f32 %v273_v31, %v1082_v21 }
  0xb0   :  { %v548_v37 = vsel %vm547_vm1, %v936_v62, 0.0  ;;  %v153_v50 = vsel %vm152_vm14, 5, %v151_v47  ;;  %vm575_vm14 = vcmp.eq.s32.totalorder %v1090_v28, 7  ;;  %vm579_vm1 = vcmp.eq.s32.totalorder %v1090_v28, 8 }
  0xb1   :  { %vm234_vm2 = vcmp.eq.s32.totalorder %v232_v27, 0  ;;  %v552_v43 = vsel %vm551_vm3, %v938_v63, %v548_v37  ;;  %vm583_vm3 = vcmp.eq.s32.totalorder %v1090_v28, 9 }
  0xb2   :  { %vm235_vm7 = vmand %vm233_vm5, %vm234_vm2  ;;  %v556_v48 = vsel %vm555_vm6, %v940_v0, %v552_v43  ;;  %vm563_vm5 = vcmp.eq.s32.totalorder %v1090_v28, 4 }
  0xb3   :  { %v237_v39 = vsel %vm235_vm7, 1, %v862_v2  ;;  %v1117_v44 = vsel %vm235_vm7, -1e+30, %v1007_v41  ;;  %v560_v51 = vsel %vm559_vm10, %v942_v3, %v556_v48  ;;  %v155_v41 = vsel %vm154_vm11, 4, %v153_v50 }
  0xb4   :  { %v238_v46 = vadd.s32 %v237_v39, %v232_v27  ;;  %v564_v53 = vsel %vm563_vm5, %v946_v5, %v560_v51  ;;  %v157_v54 = vsel %vm156_vm8, 3, %v155_v41  ;;  %v275_v58 = vmax.f32 %v274_v40, %v1117_v44 }
  0xb5   :  { %v568_v56 = vsel %vm567_vm9, %v949_v7, %v564_v53  ;;  %vm1622_vm11 = vcmp.eq.f32.partialorder %v940_v0, %v966_v18  ;;  %vm1623_vm8 = vcmp.eq.f32.partialorder %v938_v63, %v966_v18  ;;  %vm641_vm5 = vcmp.lt.f32.partialorder %v966_v18, 1.0 }
  0xb6   :  { %vm240_vm13 = vcmp.eq.s32.totalorder %v238_v46, 0  ;;  %v159_v61 = vsel %vm1622_vm11, 2, %v157_v54  ;;  %v572_v4 = vsel %vm571_vm4, %v952_v9, %v568_v56  ;;  %vm251_vm9 = vcmp.eq.f32.partialorder %v1037_v52, %v1067_v10 }
  0xb7   :  { %vm241_vm2 = vmand %vm239_vm15, %vm240_vm13  ;;  %v161_v14 = vsel %vm1623_vm8, 1, %v159_v61  ;;  %v576_v16 = vsel %vm575_vm14, %v955_v11, %v572_v4  ;;  %vm1624_vm15 = vcmp.eq.f32.partialorder %v936_v62, %v966_v18  ;;  %v1184_v39 = vmul.f32 0.6931472, %v765_v30 }
  0xb8   :  { %v243_v57 = vsel %vm241_vm2, 1, %v862_v2  ;;  %v1150_v6 = vsel %vm241_vm2, -1e+30, %v1017_v45  ;;  %v1159_v20 = vsel %vm1624_vm15, 0, %v161_v14  ;;  %v580_v27 = vsel %vm579_vm1, %v958_v13, %v576_v16 }
  0xb9   :  { %v244_v12 = vadd.s32 %v243_v57, %v238_v46  ;;  %v1164_v45 = vsel %vm583_vm3, %v961_v15, %v580_v27  ;;  %674 = vst.msk [vmem:[#allocation8] ss:$8 sm:$0x3] %vm893_vm0, %v1159_v20  ;;  %v276_v31 = vmax.f32 %v275_v58, %v1150_v6  ;;  %vm263_vm4 = vcmp.eq.f32.partialorder %v1054_v59, %v1067_v10 }
  0xba   :  { %vm587_vm10 = vcmp.lt.f32.partialorder %v1164_v45, 0.1  ;;  %v125_v42 = vsub.f32 %v903_v22, %v1184_v39  ;;  %v642_v43 = vsel %vm641_vm5, 1, %v862_v2  ;;  %v126_v46 = vsub.f32 %v905_v23, %v1184_v39 }
  0xbb   :  { %vm246_vm7 = vcmp.eq.s32.totalorder %v244_v12, 0  ;;  %v1179_v60 = vsel %vm587_vm10, 1, %v862_v2  ;;  %v127_v47 = vsub.f32 %v907_v24, %v1184_v39  ;;  %v128_v48 = vsub.f32 %v909_v25, %v1184_v39 }
  0xbc   :  { %vm247_vm6 = vmand %vm245_vm12, %vm246_vm7  ;;  %680 = vst.msk [vmem:[#allocation8 + $0x2] ss:$8 sm:$0x3] %vm893_vm0, %v1179_v60  ;;  %vm257_vm12 = vcmp.eq.f32.partialorder %v1044_v55, %v1067_v10  ;;  %v590_v50 = vmul.u32 %v1179_v60, %v1159_v20  ;;  %v129_v41 = vsub.f32 %v911_v26, %v1184_v39  ;;  %v130_v23 = vsub.f32 %v915_v29, %v1184_v39 }
  0xbd   :  { %v1175_v33 = vsel %vm247_vm6, -1e+30, %v1027_v49  ;;  %v249_v35 = vsel %vm247_vm6, 1, %v862_v2  ;;  %v589_v49 = vsub.s32 1, %v1179_v60  ;;  %v131_v24 = vsub.f32 %v919_v32, %v1184_v39 }
  0xbe   :  { %v250_v37 = vadd.s32 %v249_v35, %v244_v12  ;;  %v277_v40 = vmax.f32 %v276_v31, %v1175_v33  ;;  %v643_v54 = vmul.u32 %v642_v43, %v1179_v60  ;;  %v132_v56 = vsub.f32 %v922_v34, %v1184_v39 }
  0xbf   :  { %v591_v25 = vmul.u32 %v589_v49, %v1090_v28  ;;  %v133_v26 = vsub.f32 %v925_v36, %v1184_v39  ;;  %v612_v57 = vsub.f32 0.0, %v125_v42  ;;  %vm269_vm1 = vcmp.eq.f32.partialorder %v1064_v8, %v1067_v10 }
  0xc0   :  { %vm252_vm13 = vcmp.eq.s32.totalorder %v250_v37, 0  ;;  %v134_v29 = vsub.f32 %v928_v38, %v1184_v39  ;;  %v615_v58 = vsub.f32 0.0, %v126_v46  ;;  %v618_v61 = vsub.f32 0.0, %v127_v47 }
  0xc1   :  { %vm253_vm2 = vmand %vm251_vm9, %vm252_vm13  ;;  %v592_v32 = vadd.s32 %v591_v25, %v590_v50  ;;  %v621_v4 = vsub.f32 0.0, %v128_v48  ;;  %v624_v34 = vsub.f32 0.0, %v129_v41  ;;  %v627_v12 = vsub.f32 0.0, %v130_v23 }
  0xc2   :  { %v1207_v51 = vsel %vm253_vm2, -1e+30, %v1037_v52  ;;  %v255_v22 = vsel %vm253_vm2, 1, %v862_v2  ;;  %v630_v27 = vsub.f32 0.0, %v131_v24  ;;  %v633_v30 = vsub.f32 0.0, %v132_v56 }
  0xc3   :  { %v256_v53 = vadd.s32 %v255_v22, %v250_v37  ;;  %v278_v52 = vmax.f32 %v277_v40, %v1207_v51  ;;  %vm611_vm8 = vcmp.eq.s32.totalorder %v592_v32, 0  ;;  %vm614_vm15 = vcmp.eq.s32.totalorder %v592_v32, 1  ;;  %677 = vst.msk [vmem:[#allocation8 + $0x1] ss:$8 sm:$0x3] %vm893_vm0, %v592_v32 }
  0xc4   :  { %v613_v16 = vsel %vm611_vm8, %v612_v57, 0.0  ;;  %vm617_vm3 = vcmp.eq.s32.totalorder %v592_v32, 2  ;;  %vm620_vm7 = vcmp.eq.s32.totalorder %v592_v32, 3  ;;  %vm623_vm6 = vcmp.eq.s32.totalorder %v592_v32, 4 }
  0xc5   :  { %vm258_vm14 = vcmp.eq.s32.totalorder %v256_v53, 0  ;;  %v616_v31 = vsel %vm614_vm15, %v615_v58, %v613_v16  ;;  %vm626_vm5 = vcmp.eq.s32.totalorder %v592_v32, 5  ;;  %v636_v39 = vsub.f32 0.0, %v133_v26 }
  0xc6   :  { %vm259_vm11 = vmand %vm257_vm12, %vm258_vm14  ;;  %vm629_vm12 = vcmp.eq.s32.totalorder %v592_v32, 6  ;;  %v644_v40 = vsub.s32 1, %v643_v54  ;;  %vm632_vm13 = vcmp.eq.s32.totalorder %v592_v32, 7  ;;  %vm635_vm2 = vcmp.eq.s32.totalorder %v592_v32, 8 }
  0xc7   :  { %v1233_v36 = vsel %vm259_vm11, -1e+30, %v1044_v55  ;;  %v261_v14 = vsel %vm259_vm11, 1, %v862_v2  ;;  %v619_v55 = vsel %vm617_vm3, %v618_v61, %v616_v31  ;;  %v639_v50 = vsub.f32 0.0, %v134_v29 }
  0xc8   :  { %v262_v38 = vadd.s32 %v261_v14, %v256_v53  ;;  %v279_v35 = vmax.f32 %v278_v52, %v1233_v36  ;;  %v622_v37 = vsel %vm620_vm7, %v621_v4, %v619_v55  ;;  %vm638_vm14 = vcmp.eq.s32.totalorder %v592_v32, 9 }
  0xc9   :  { %v625_v46 = vsel %vm623_vm6, %v624_v34, %v622_v37  ;;  %v645_v23 = vcvt.s32.f32 %v644_v40  ;;  %v539_v26 = vmin.f32 %v942_v3, %v940_v0 }
  0xca   :  { %vm264_vm10 = vcmp.eq.s32.totalorder %v262_v38, 0  ;;  %v628_v48 = vsel %vm626_vm5, %v627_v12, %v625_v46 }
  0xcb   :  { %vm265_vm9 = vmand %vm263_vm4, %vm264_vm10  ;;  %v631_v41 = vsel %vm629_vm12, %v630_v27, %v628_v48  ;;  %v540_v29 = vmin.f32 %v539_v26, %v946_v5 }
  0xcc   :  { %v1243_v42 = vsel %vm265_vm9, -1e+30, %v1054_v59  ;;  %v267_v43 = vsel %vm265_vm9, 1, %v862_v2  ;;  %v634_v53 = vsel %vm632_vm13, %v633_v30, %v631_v41 }
  0xcd   :  { %v268_v47 = vadd.s32 %v267_v43, %v262_v38  ;;  %v280_v22 = vmax.f32 %v279_v35, %v1243_v42  ;;  %v637_v59 = vsel %vm635_vm2, %v636_v39, %v634_v53  ;;  %v541_v34 = vmin.f32 %v540_v29, %v949_v7 }
  0xce   :  { %v640_v25 = vsel %vm638_vm14, %v639_v50, %v637_v59 }
  0xcf   :  { %vm270_vm4 = vcmp.eq.s32.totalorder %v268_v47, 0  ;;  %v646_v52 = vmul.f32 %v645_v23, %v640_v25 }
  0xd0   :  { %vm271_vm11 = vmand %vm269_vm1, %vm270_vm4 }
  0xd1   :  { %v1251_v24 = vsel %vm271_vm11, -1e+30, %v1064_v8  ;;  %666 = vst.msk [vmem:[#allocation7 + $0x5] ss:$8 sm:$0x3] %vm893_vm0, %v646_v52 }
  0xd2   :  { %v1254_v54 = vmax.f32 %v280_v22, %v1251_v24  ;;  %v538_v22 = vmin.f32 %v936_v62, %v938_v63 }
  0xd4   :  { %657 = vst.msk [vmem:[#allocation7 + $0x2] ss:$8 sm:$0x3] %vm893_vm0, %v1254_v54  ;;  %vm282_vm8 = vcmp.eq.f32.partialorder %v1077_v17, %v1254_v54  ;;  %vm285_vm15 = vcmp.eq.f32.partialorder %v1079_v19, %v1254_v54  ;;  %vm291_vm7 = vcmp.eq.f32.partialorder %v1082_v21, %v1254_v54  ;;  %vm297_vm5 = vcmp.eq.f32.partialorder %v1117_v44, %v1254_v54 }
  0xd5   :  { %v284_v8 = vsel %vm282_vm8, 1, %v862_v2  ;;  %vm729_vm1 = vmneg %vm282_vm8  ;;  %v1274_v58 = vsel %vm282_vm8, -1e+30, %v1077_v17  ;;  %vm303_vm13 = vcmp.eq.f32.partialorder %v1150_v6, %v1254_v54  ;;  %vm309_vm4 = vcmp.eq.f32.partialorder %v1175_v33, %v1254_v54 }
  0xd6   :  { %vm287_vm3 = vmand %vm285_vm15, %vm729_vm1  ;;  %vm315_vm15 = vcmp.eq.f32.partialorder %v1207_v51, %v1254_v54 }
  0xd7   :  { %v289_v56 = vsel %vm287_vm3, 1, %v862_v2  ;;  %v1277_v61 = vsel %vm287_vm3, -1e+30, %v1079_v19  ;;  %v542_v19 = vmin.f32 %v541_v34, %v952_v9 }
  0xd8   :  { %v290_v57 = vadd.s32 %v289_v56, %v284_v8  ;;  %v337_v12 = vmax.f32 %v1274_v58, %v1277_v61 }
  0xda   :  { %vm292_vm6 = vcmp.eq.s32.totalorder %v290_v57, 0 }
  0xdb   :  { %vm293_vm10 = vmand %vm291_vm7, %vm292_vm6  ;;  %vm321_vm7 = vcmp.eq.f32.partialorder %v1233_v36, %v1254_v54 }
  0xdc   :  { %v295_v32 = vsel %vm293_vm10, 1, %v862_v2  ;;  %v1285_v14 = vsel %vm293_vm10, -1e+30, %v1082_v21  ;;  %v543_v21 = vmin.f32 %v542_v19, %v955_v11 }
  0xdd   :  { %v296_v4 = vadd.s32 %v295_v32, %v290_v57  ;;  %v338_v16 = vmax.f32 %v337_v12, %v1285_v14 }
  0xdf   :  { %vm298_vm9 = vcmp.eq.s32.totalorder %v296_v4, 0 }
  0xe0   :  { %vm299_vm12 = vmand %vm297_vm5, %vm298_vm9  ;;  %vm327_vm5 = vcmp.eq.f32.partialorder %v1243_v42, %v1254_v54 }
  0xe1   :  { %v301_v17 = vsel %vm299_vm12, 1, %v862_v2  ;;  %v1293_v27 = vsel %vm299_vm12, -1e+30, %v1117_v44  ;;  %v544_v44 = vmin.f32 %v543_v21, %v958_v13 }
  0xe2   :  { %v302_v38 = vadd.s32 %v301_v17, %v296_v4  ;;  %v339_v35 = vmax.f32 %v338_v16, %v1293_v27 }
  0xe4   :  { %vm304_vm2 = vcmp.eq.s32.totalorder %v302_v38, 0 }
  0xe5   :  { %vm305_vm14 = vmand %vm303_vm13, %vm304_vm2  ;;  %vm333_vm13 = vcmp.eq.f32.partialorder %v1251_v24, %v1254_v54 }
  0xe6   :  { %v307_v31 = vsel %vm305_vm14, 1, %v862_v2  ;;  %v1301_v55 = vsel %vm305_vm14, -1e+30, %v1150_v6  ;;  %v545_v6 = vmin.f32 %v544_v44, %v961_v15 }
  0xe7   :  { %v308_v30 = vadd.s32 %v307_v31, %v302_v38  ;;  %v340_v40 = vmax.f32 %v339_v35, %v1301_v55 }
  0xe8   :  { %v546_v53 = vmin.f32 %v545_v6, %v538_v22 }
  0xe9   :  { %vm310_vm11 = vcmp.eq.s32.totalorder %v308_v30, 0 }
  0xea   :  { %vm311_vm8 = vmand %vm309_vm4, %vm310_vm11  ;;  %768 = vrcp.f32 %v546_v53 }
  0xeb   :  { %v313_v37 = vsel %vm311_vm8, 1, %v862_v2  ;;  %v1309_v43 = vsel %vm311_vm8, -1e+30, %v1175_v33 }
  0xec   :  { %v314_v39 = vadd.s32 %v313_v37, %v308_v30  ;;  %v341_v47 = vmax.f32 %v340_v40, %v1309_v43 }
  0xee   :  { %vm316_vm1 = vcmp.eq.s32.totalorder %v314_v39, 0 }
  0xef   :  { %vm317_vm3 = vmand %vm315_vm15, %vm316_vm1 }
  0xf0   :  { %v319_v46 = vsel %vm317_vm3, 1, %v862_v2  ;;  %v1315_v48 = vsel %vm317_vm3, -1e+30, %v1207_v51 }
  0xf1   :  { %v320_v50 = vadd.s32 %v319_v46, %v314_v39  ;;  %v342_v33 = vmax.f32 %v341_v47, %v1315_v48 }
  0xf3   :  { %vm322_vm6 = vcmp.eq.s32.totalorder %v320_v50, 0 }
  0xf4   :  { %vm323_vm10 = vmand %vm321_vm7, %vm322_vm6 }
  0xf5   :  { %v1323_v41 = vsel %vm323_vm10, -1e+30, %v1233_v36  ;;  %v325_v23 = vsel %vm323_vm10, 1, %v862_v2 }
  0xf6   :  { %v326_v59 = vadd.s32 %v325_v23, %v320_v50  ;;  %v343_v51 = vmax.f32 %v342_v33, %v1323_v41 }
  0xf8   :  { %vm328_vm9 = vcmp.eq.s32.totalorder %v326_v59, 0 }
  0xf9   :  { %vm329_vm12 = vmand %vm327_vm5, %vm328_vm9  ;;  %vm598_vm5 = vcmp.lt.f32.partialorder %v1164_v45, %v1254_v54  ;;  %vm601_vm9 = vcmp.eq.s32.totalorder %v1159_v20, %v1090_v28 }
  0xfa   :  { %v1331_v25 = vsel %vm329_vm12, -1e+30, %v1243_v42  ;;  %v331_v36 = vsel %vm329_vm12, 1, %v862_v2 }
  0xfb   :  { %v332_v52 = vadd.s32 %v331_v36, %v326_v59  ;;  %v344_v8 = vmax.f32 %v343_v51, %v1331_v25 }
  0xfd   :  { %vm334_vm2 = vcmp.eq.s32.totalorder %v332_v52, 0 }
  0xfe   :  { %vm335_vm14 = vmand %vm333_vm13, %vm334_vm2 }
  0xff   :  { %v1338_v56 = vsel %vm335_vm14, -1e+30, %v1251_v24  ;;  %v767_v24 = vpop.eup %766 }
 0x100   :  { %v1341_v26 = vmax.f32 %v344_v8, %v1338_v56  ;;  %v769_v29 = vpop.eup %768  ;;  %v594_v34 = vmul.f32 %v767_v24, %v966_v18  ;;  %v1380_v18 = vld [vmem:[#allocation5 + $0x1] ss:$2 sm:$0x3] }
 0x101   :  { %v596_v12 = vmul.f32 %v769_v29, %v1067_v10  ;;  %v602_v10 = vsel %vm601_vm9, 1, %v862_v2  ;;  %vm603_vm2 = vcmp.eq.s32.totalorder %v1159_v20, %v1380_v18 }
 0x102   :  { %660 = vst.msk [vmem:[#allocation7 + $0x3] ss:$8 sm:$0x3] %vm893_vm0, %v1341_v26  ;;  %vm346_vm4 = vcmp.eq.f32.partialorder %v1274_v58, %v1341_v26  ;;  %vm349_vm11 = vcmp.eq.f32.partialorder %v1277_v61, %v1341_v26  ;;  %vm355_vm1 = vcmp.eq.f32.partialorder %v1285_v14, %v1341_v26  ;;  %vm361_vm6 = vcmp.eq.f32.partialorder %v1293_v27, %v1341_v26 }
 0x103   :  { %v348_v42 = vsel %vm346_vm4, 1, %v862_v2  ;;  %vm730_vm8 = vmneg %vm346_vm4  ;;  %v1375_v38 = vsel %vm346_vm4, -1e+30, %v1274_v58  ;;  %vm597_vm10 = vcmp.gt.f32.partialorder %v594_v34, %v596_v12  ;;  %v606_v31 = vmul.u32 %v602_v10, %v589_v49 }
 0x104   :  { %vm351_vm15 = vmand %vm349_vm11, %vm730_vm8  ;;  %vm367_vm4 = vcmp.eq.f32.partialorder %v1301_v55, %v1341_v26  ;;  %v604_v20 = vsel %vm603_vm2, 1, %v862_v2 }
 0x105   :  { %v353_v57 = vsel %vm351_vm15, 1, %v862_v2  ;;  %v1378_v19 = vsel %vm351_vm15, -1e+30, %v1277_v61  ;;  %vm599_vm13 = vmand %vm597_vm10, %vm598_vm5  ;;  %vm373_vm15 = vcmp.eq.f32.partialorder %v1309_v43, %v1341_v26  ;;  %vm385_vm5 = vcmp.eq.f32.partialorder %v1323_v41, %v1341_v26 }
 0x106   :  { %v354_v32 = vadd.s32 %v353_v57, %v348_v42  ;;  %v401_v58 = vmax.f32 %v1375_v38, %v1378_v19  ;;  %v600_v61 = vsel %vm599_vm13, 1, %v862_v2  ;;  %vm391_vm13 = vcmp.eq.f32.partialorder %v1331_v25, %v1341_v26 }
 0x107   :  { %v605_v54 = vmul.u32 %v600_v61, %v1179_v60 }
 0x108   :  { %vm356_vm3 = vcmp.eq.s32.totalorder %v354_v32, 0 }
 0x109   :  { %vm1360_vm7 = vmand %vm355_vm1, %vm356_vm3  ;;  %v607_v21 = vadd.s32 %v606_v31, %v605_v54 }
 0x10a   :  { %v359_v17 = vsel %vm1360_vm7, 1, %v862_v2  ;;  %v1397_v28 = vsel %vm1360_vm7, -1e+30, %v1285_v14  ;;  %vm379_vm7 = vcmp.eq.f32.partialorder %v1315_v48, %v1341_v26 }
 0x10b   :  { %v360_v16 = vadd.s32 %v359_v17, %v354_v32  ;;  %v402_v35 = vmax.f32 %v401_v58, %v1397_v28  ;;  %686 = vst.msk [vmem:[#allocation8 + $0x4] ss:$8 sm:$0x3] %vm893_vm0, %v607_v21  ;;  %v608_v14 = vmul.u32 %v607_v21, %v604_v20 }
 0x10d   :  { %vm362_vm12 = vcmp.eq.s32.totalorder %v360_v16, 0  ;;  %689 = vst.msk [vmem:[#allocation8 + $0x5] ss:$8 sm:$0x3] %vm893_vm0, %v608_v14 }
 0x10e   :  { %vm363_vm14 = vmand %vm361_vm6, %vm362_vm12 }
 0x10f   :  { %v365_v45 = vsel %vm363_vm14, 1, %v862_v2  ;;  %v1406_v49 = vsel %vm363_vm14, -1e+30, %v1293_v27 }
 0x110   :  { %v366_v30 = vadd.s32 %v365_v45, %v360_v16  ;;  %v403_v44 = vmax.f32 %v402_v35, %v1406_v49 }
 0x112   :  { %vm368_vm11 = vcmp.eq.s32.totalorder %v366_v30, 0 }
 0x113   :  { %vm369_vm8 = vmand %vm367_vm4, %vm368_vm11  ;;  %vm397_vm4 = vcmp.eq.f32.partialorder %v1338_v56, %v1341_v26 }
 0x114   :  { %v371_v60 = vsel %vm369_vm8, 1, %v862_v2  ;;  %v1417_v39 = vsel %vm369_vm8, -1e+30, %v1301_v55 }
 0x115   :  { %v372_v37 = vadd.s32 %v371_v60, %v366_v30  ;;  %v404_v6 = vmax.f32 %v403_v44, %v1417_v39 }
 0x117   :  { %vm374_vm1 = vcmp.eq.s32.totalorder %v372_v37, 0 }
 0x118   :  { %vm375_vm3 = vmand %vm373_vm15, %vm374_vm1 }
 0x119   :  { %v377_v27 = vsel %vm375_vm3, 1, %v862_v2  ;;  %v1424_v46 = vsel %vm375_vm3, -1e+30, %v1309_v43 }
 0x11a   :  { %v378_v40 = vadd.s32 %v377_v27, %v372_v37  ;;  %v405_v55 = vmax.f32 %v404_v6, %v1424_v46 }
 0x11c   :  { %vm380_vm6 = vcmp.eq.s32.totalorder %v378_v40, 0 }
 0x11d   :  { %vm381_vm10 = vmand %vm379_vm7, %vm380_vm6 }
 0x11e   :  { %v383_v47 = vsel %vm381_vm10, 1, %v862_v2  ;;  %v1429_v50 = vsel %vm381_vm10, -1e+30, %v1315_v48 }
 0x11f   :  { %v384_v22 = vadd.s32 %v383_v47, %v378_v40  ;;  %v406_v33 = vmax.f32 %v405_v55, %v1429_v50 }
 0x121   :  { %vm386_vm9 = vcmp.eq.s32.totalorder %v384_v22, 0 }
 0x122   :  { %vm387_vm12 = vmand %vm385_vm5, %vm386_vm9 }
 0x123   :  { %v1435_v43 = vsel %vm387_vm12, -1e+30, %v1323_v41  ;;  %v389_v23 = vsel %vm387_vm12, 1, %v862_v2 }
 0x124   :  { %v390_v53 = vadd.s32 %v389_v23, %v384_v22  ;;  %v407_v48 = vmax.f32 %v406_v33, %v1435_v43 }
 0x126   :  { %vm392_vm2 = vcmp.eq.s32.totalorder %v390_v53, 0 }
 0x127   :  { %vm393_vm14 = vmand %vm391_vm13, %vm392_vm2 }
 0x128   :  { %v1442_v59 = vsel %vm393_vm14, -1e+30, %v1331_v25  ;;  %v395_v51 = vsel %vm393_vm14, 1, %v862_v2 }
 0x129   :  { %v396_v36 = vadd.s32 %v395_v51, %v390_v53  ;;  %v408_v41 = vmax.f32 %v407_v48, %v1442_v59 }
 0x12b   :  { %vm398_vm11 = vcmp.eq.s32.totalorder %v396_v36, 0 }
 0x12c   :  { %vm399_vm8 = vmand %vm397_vm4, %vm398_vm11 }
 0x12d   :  { %v1449_v52 = vsel %vm399_vm8, -1e+30, %v1338_v56 }
 0x12e   :  { %v1452_v8 = vmax.f32 %v408_v41, %v1449_v52 }
 0x130   :  { %663 = vst.msk [vmem:[#allocation7 + $0x4] ss:$8 sm:$0x3] %vm893_vm0, %v1452_v8  ;;  %vm410_vm15 = vcmp.eq.f32.partialorder %v1375_v38, %v1452_v8  ;;  %vm413_vm1 = vcmp.eq.f32.partialorder %v1378_v19, %v1452_v8 }
 0x131   :  { %v412_v25 = vsel %vm410_vm15, 1, %v862_v2  ;;  %vm731_vm3 = vmneg %vm410_vm15 }
 0x132   :  { %821 = shalt.err (!%p818_p0)
}
 0x133   :  { %706 = dma.vmem_to_hbm [thread:$0]  %s704_s1, 256, %s1615_s2, [#allocation4]   ;;  %vm415_vm7 = vmand %vm413_vm1, %vm731_vm3  ;;  %vm419_vm6 = vcmp.eq.f32.partialorder %v1397_v28, %v1452_v8  ;;  %v1479_v24 = vsel %vm410_vm15, -1e+30, %v1375_v38  ;;  %vm425_vm9 = vcmp.eq.f32.partialorder %v1406_v49, %v1452_v8  ;;  %vm431_vm2 = vcmp.eq.f32.partialorder %v1417_v39, %v1452_v8 }
 0x134   :  { %v417_v56 = vsel %vm415_vm7, 1, %v862_v2  ;;  %v1482_v57 = vsel %vm415_vm7, -1e+30, %v1378_v19  ;;  %vm437_vm11 = vcmp.eq.f32.partialorder %v1424_v46, %v1452_v8  ;;  %vm443_vm1 = vcmp.eq.f32.partialorder %v1429_v50, %v1452_v8  ;;  %s866_s2 = smov [#allocation8]  }
 0x135   :  { %v418_v26 = vadd.s32 %v417_v56, %v412_v25  ;;  %v465_v32 = vmax.f32 %v1479_v24, %v1482_v57  ;;  %s713_s27 = sshll.u32 %s866_s2, 4  ;;  %s714_s27 = int_to_ptr.vmem [resolvable:$true] %s713_s27 }
 0x136   :  { %s830_s28 = scalar_lea.vmem %s714_s27, 256  ;;  %p835_p2 = scmp.lt.s32.totalorder %s714_s27, %s714_s27 }
 0x137   :  { %vm420_vm10 = vcmp.eq.s32.totalorder %v418_v26, 0  ;;  %p831_p1 = scmp.ne.s32.totalorder %s714_s27, %s830_s28  ;;  %p836_p3 = scmp.lt.s32.totalorder %s830_s28, %s830_s28 }
 0x138   :  { %vm421_vm5 = vmand %vm419_vm6, %vm420_vm10  ;;  %vm449_vm6 = vcmp.eq.f32.partialorder %v1435_v43, %v1452_v8 }
 0x139   :  { %v423_v42 = vsel %vm421_vm5, 1, %v862_v2  ;;  %v1489_v4 = vsel %vm421_vm5, -1e+30, %v1397_v28  ;;  %p837_p4 = por %p836_p3, %p835_p2 }
 0x13a   :  { %v424_v29 = vadd.s32 %v423_v42, %v418_v26  ;;  %v466_v17 = vmax.f32 %v465_v32, %v1489_v4 }
 0x13b   :  { %p838_p5 = pnand %p837_p4, %p831_p1 }
 0x13c   :  { %vm426_vm12 = vcmp.eq.s32.totalorder %v424_v29, 0 }
 0x13d   :  { %vm427_vm13 = vmand %vm425_vm9, %vm426_vm12  ;;  %vm455_vm9 = vcmp.eq.f32.partialorder %v1442_v59, %v1452_v8 }
 0x13e   :  { %v429_v34 = vsel %vm427_vm13, 1, %v862_v2  ;;  %v1496_v38 = vsel %vm427_vm13, -1e+30, %v1406_v49 }
 0x13f   :  { %v430_v12 = vadd.s32 %v429_v34, %v424_v29  ;;  %v467_v10 = vmax.f32 %v466_v17, %v1496_v38 }
 0x141   :  { %vm432_vm14 = vcmp.eq.s32.totalorder %v430_v12, 0 }
 0x142   :  { %vm433_vm4 = vmand %vm431_vm2, %vm432_vm14  ;;  %vm461_vm2 = vcmp.eq.f32.partialorder %v1449_v52, %v1452_v8 }
 0x143   :  { %v435_v19 = vsel %vm433_vm4, 1, %v862_v2  ;;  %v1503_v58 = vsel %vm433_vm4, -1e+30, %v1417_v39 }
 0x144   :  { %v436_v16 = vadd.s32 %v435_v19, %v430_v12  ;;  %v468_v28 = vmax.f32 %v467_v10, %v1503_v58 }
 0x146   :  { %vm438_vm8 = vcmp.eq.s32.totalorder %v436_v16, 0 }
 0x147   :  { %vm439_vm15 = vmand %vm437_vm11, %vm438_vm8 }
 0x148   :  { %v441_v61 = vsel %vm439_vm15, 1, %v862_v2  ;;  %v1510_v45 = vsel %vm439_vm15, -1e+30, %v1424_v46 }
 0x149   :  { %v442_v31 = vadd.s32 %v441_v61, %v436_v16  ;;  %v469_v30 = vmax.f32 %v468_v28, %v1510_v45 }
 0x14b   :  { %vm444_vm3 = vcmp.eq.s32.totalorder %v442_v31, 0 }
 0x14c   :  { %vm445_vm7 = vmand %vm443_vm1, %vm444_vm3 }
 0x14d   :  { %v447_v54 = vsel %vm445_vm7, 1, %v862_v2  ;;  %v1515_v20 = vsel %vm445_vm7, -1e+30, %v1429_v50 }
 0x14e   :  { %v448_v21 = vadd.s32 %v447_v54, %v442_v31  ;;  %v470_v35 = vmax.f32 %v469_v30, %v1515_v20 }
 0x150   :  { %vm450_vm10 = vcmp.eq.s32.totalorder %v448_v21, 0 }
 0x151   :  { %vm451_vm5 = vmand %vm449_vm6, %vm450_vm10 }
 0x152   :  { %v1521_v49 = vsel %vm451_vm5, -1e+30, %v1435_v43  ;;  %v453_v14 = vsel %vm451_vm5, 1, %v862_v2 }
 0x153   :  { %v454_v60 = vadd.s32 %v453_v14, %v448_v21  ;;  %v471_v37 = vmax.f32 %v470_v35, %v1521_v49 }
 0x155   :  { %vm456_vm12 = vcmp.eq.s32.totalorder %v454_v60, 0 }
 0x156   :  { %vm457_vm13 = vmand %vm455_vm9, %vm456_vm12  ;;  %vm549_vm12 = vcmp.eq.s32.totalorder %v1380_v18, 0 }
 0x157   :  { %v1528_v44 = vsel %vm457_vm13, -1e+30, %v1442_v59  ;;  %v459_v39 = vsel %vm457_vm13, 1, %v862_v2 }
 0x158   :  { %v460_v27 = vadd.s32 %v459_v39, %v454_v60  ;;  %v472_v40 = vmax.f32 %v471_v37, %v1528_v44 }
 0x15a   :  { %vm462_vm14 = vcmp.eq.s32.totalorder %v460_v27, 0 }
 0x15b   :  { %vm463_vm4 = vmand %vm461_vm2, %vm462_vm14  ;;  %vm553_vm14 = vcmp.eq.s32.totalorder %v1380_v18, 1 }
 0x15c   :  { %v1535_v6 = vsel %vm463_vm4, -1e+30, %v1449_v52  ;;  %v550_v52 = vsel %vm549_vm12, %v936_v62, 0.0 }
 0x15d   :  { %v1538_v46 = vmax.f32 %v472_v40, %v1535_v6  ;;  %v554_v26 = vsel %vm553_vm14, %v938_v63, %v550_v52 }
 0x15f   :  { %vm474_vm11 = vcmp.eq.f32.partialorder %v1479_v24, %v1538_v46  ;;  %vm477_vm8 = vcmp.eq.f32.partialorder %v1482_v57, %v1538_v46  ;;  %vm483_vm3 = vcmp.eq.f32.partialorder %v1489_v4, %v1538_v46  ;;  %vm489_vm10 = vcmp.eq.f32.partialorder %v1496_v38, %v1538_v46 }
 0x160   :  { %v476_v47 = vsel %vm474_vm11, 1, %v862_v2  ;;  %vm732_vm15 = vmneg %vm474_vm11  ;;  %v475_v33 = vsel %vm474_vm11, -1e+30, %v1479_v24  ;;  %vm495_vm13 = vcmp.eq.f32.partialorder %v1503_v58, %v1538_v46  ;;  %vm501_vm11 = vcmp.eq.f32.partialorder %v1510_v45, %v1538_v46 }
 0x161   :  { %vm479_vm1 = vmand %vm477_vm8, %vm732_vm15  ;;  %vm557_vm8 = vcmp.eq.s32.totalorder %v1380_v18, 2  ;;  %vm513_vm12 = vcmp.eq.f32.partialorder %v1521_v49, %v1538_v46 }
 0x162   :  { %v481_v55 = vsel %vm479_vm1, 1, %v862_v2  ;;  %v480_v43 = vsel %vm479_vm1, -1e+30, %v1482_v57  ;;  %v558_v24 = vsel %vm557_vm8, %v940_v0, %v554_v26 }
 0x163   :  { %v482_v50 = vadd.s32 %v481_v55, %v476_v47  ;;  %v529_v48 = vmax.f32 %v475_v33, %v480_v43 }
 0x165   :  { %vm484_vm7 = vcmp.eq.s32.totalorder %v482_v50, 0 }
 0x166   :  { %vm485_vm6 = vmand %vm483_vm3, %vm484_vm7  ;;  %vm561_vm3 = vcmp.eq.s32.totalorder %v1380_v18, 3  ;;  %vm507_vm7 = vcmp.eq.f32.partialorder %v1515_v20, %v1538_v46 }
 0x167   :  { %v487_v22 = vsel %vm485_vm6, 1, %v862_v2  ;;  %v486_v59 = vsel %vm485_vm6, -1e+30, %v1489_v4  ;;  %v562_v4 = vsel %vm561_vm3, %v942_v3, %v558_v24  ;;  %vm565_vm6 = vcmp.eq.s32.totalorder %v1380_v18, 4 }
 0x168   :  { %v488_v23 = vadd.s32 %v487_v22, %v482_v50  ;;  %v530_v41 = vmax.f32 %v529_v48, %v486_v59  ;;  %v566_v12 = vsel %vm565_vm6, %v946_v5, %v562_v4  ;;  %vm525_vm3 = vcmp.eq.f32.partialorder %v1535_v6, %v1538_v46 }
 0x16a   :  { %vm490_vm5 = vcmp.eq.s32.totalorder %v488_v23, 0 }
 0x16b   :  { %vm1553_vm9 = vmand %vm489_vm10, %vm490_vm5 }
 0x16c   :  { %v493_v51 = vsel %vm1553_vm9, 1, %v862_v2  ;;  %v492_v8 = vsel %vm1553_vm9, -1e+30, %v1496_v38  ;;  %vm569_vm9 = vcmp.eq.s32.totalorder %v1380_v18, 5 }
 0x16d   :  { %v494_v36 = vadd.s32 %v493_v51, %v488_v23  ;;  %v531_v42 = vmax.f32 %v530_v41, %v492_v8  ;;  %v570_v3 = vsel %vm569_vm9, %v949_v7, %v566_v12 }
 0x16f   :  { %vm496_vm2 = vcmp.eq.s32.totalorder %v494_v36, 0 }
 0x170   :  { %vm497_vm4 = vmand %vm495_vm13, %vm496_vm2  ;;  %vm573_vm2 = vcmp.eq.s32.totalorder %v1380_v18, 6 }
 0x171   :  { %v499_v25 = vsel %vm497_vm4, 1, %v862_v2  ;;  %v498_v62 = vsel %vm497_vm4, -1e+30, %v1503_v58  ;;  %vm519_vm4 = vcmp.eq.f32.partialorder %v1528_v44, %v1538_v46  ;;  %v574_v58 = vsel %vm573_vm2, %v952_v9, %v570_v3 }
 0x172   :  { %v500_v56 = vadd.s32 %v499_v25, %v494_v36  ;;  %v532_v32 = vmax.f32 %v531_v42, %v498_v62 }
 0x174   :  { %vm502_vm15 = vcmp.eq.s32.totalorder %v500_v56, 0 }
 0x175   :  { %vm503_vm1 = vmand %vm501_vm11, %vm502_vm15  ;;  %vm577_vm11 = vcmp.eq.s32.totalorder %v1380_v18, 7 }
 0x176   :  { %v505_v57 = vsel %vm503_vm1, 1, %v862_v2  ;;  %v504_v63 = vsel %vm503_vm1, -1e+30, %v1510_v45  ;;  %v578_v7 = vsel %vm577_vm11, %v955_v11, %v574_v58  ;;  %vm581_vm1 = vcmp.eq.s32.totalorder %v1380_v18, 8 }
 0x177   :  { %v506_v29 = vadd.s32 %v505_v57, %v500_v56  ;;  %v533_v0 = vmax.f32 %v532_v32, %v504_v63  ;;  %v582_v9 = vsel %vm581_vm1, %v958_v13, %v578_v7 }
 0x179   :  { %vm508_vm10 = vcmp.eq.s32.totalorder %v506_v29, 0 }
 0x17a   :  { %vm509_vm5 = vmand %vm507_vm7, %vm508_vm10  ;;  %vm585_vm7 = vcmp.eq.s32.totalorder %v1380_v18, 9 }
 0x17b   :  { %v511_v34 = vsel %vm509_vm5, 1, %v862_v2  ;;  %v510_v17 = vsel %vm509_vm5, -1e+30, %v1515_v20  ;;  %v586_v11 = vsel %vm585_vm7, %v961_v15, %v582_v9 }
 0x17c   :  { %v512_v38 = vadd.s32 %v511_v34, %v506_v29  ;;  %v534_v19 = vmax.f32 %v533_v0, %v510_v17 }
 0x17e   :  { %vm514_vm13 = vcmp.eq.s32.totalorder %v512_v38, 0 }
 0x17f   :  { %vm515_vm14 = vmand %vm513_vm12, %vm514_vm13 }
 0x180   :  { %v516_v16 = vsel %vm515_vm14, -1e+30, %v1521_v49  ;;  %v517_v10 = vsel %vm515_vm14, 1, %v862_v2 }
 0x181   :  { %v518_v5 = vadd.s32 %v517_v10, %v512_v38  ;;  %v535_v61 = vmax.f32 %v534_v19, %v516_v16 }
 0x183   :  { %vm520_vm8 = vcmp.eq.s32.totalorder %v518_v5, 0 }
 0x184   :  { %vm521_vm15 = vmand %vm519_vm4, %vm520_vm8 }
 0x185   :  { %v522_v31 = vsel %vm521_vm15, -1e+30, %v1528_v44  ;;  %v523_v28 = vsel %vm521_vm15, 1, %v862_v2 }
 0x186   :  { %v524_v45 = vadd.s32 %v523_v28, %v518_v5  ;;  %v536_v54 = vmax.f32 %v535_v61, %v522_v31 }
 0x188   :  { %vm526_vm6 = vcmp.eq.s32.totalorder %v524_v45, 0 }
 0x189   :  { %vm527_vm10 = vmand %vm525_vm3, %vm526_vm6 }
 0x18a   :  { %v528_v30 = vsel %vm527_vm10, -1e+30, %v1535_v6 }
 0x18b   :  { %v537_v20 = vmax.f32 %v536_v54, %v528_v30 }
 0x18d   :  { %vm609_vm5 = vcmp.le.f32.partialorder %v586_v11, %v537_v20 }
 0x18e   :  { %v610_v21 = vsel %vm609_vm5, 1, %v862_v2 }
 0x18f   :  { %683 = vst.msk [vmem:[#allocation8 + $0x3] ss:$8 sm:$0x3] %vm893_vm0, %v610_v21 }
 0x190   :  { %841 = shalt.err (!%p838_p5)
}
 0x191   :  { %716 = dma.vmem_to_hbm [thread:$0]  %s714_s27, 256, %s1616_s3, [#allocation9]  }
 0x192   :  { %854 = dma.done.wait [#allocation4], 256  }
 0x193   :  { %855 = vsyncadd [#allocation4], 4294967040 }
 0x194   :  { %856 = dma.done.wait [#allocation9], 256  }
 0x195   :  { %857 = vsyncadd [#allocation9], 4294967040 }
 0x196   :  { %723 = vsyncpa [#allocation3], 1 }
 0x197   :  { %724 = vsyncpa [#allocation6], 1 }
 0x198   :  { %725 = vsyncpa [#allocation4], 1 }
 0x199   :  { %726 = vsyncpa [#allocation9], 1 }

</bundles_post_ra>
